<compile_context>
chip_gen: v6e
topology: v6e:2x2x1
jax: 0.10.0
libtpu: 0.0.40
codegen_flags: <defaults>
</compile_context>

<pallas_src>
import functools
import math

import jax
import jax.numpy as jnp
import numpy as np
from jax import lax
from jax.experimental import pallas as pl
from jax.experimental.pallas import tpu as pltpu

_VMEM_LIMIT = 48 * 1024 * 1024


# ------------------------------------------------------------------ helpers --

def _ln(x, g, b, eps):
    """LayerNorm over the last dim; x: (N, D) f32, g/b: (1, D)."""
    mu = jnp.mean(x, axis=-1, keepdims=True)
    var = jnp.mean(jnp.square(x - mu), axis=-1, keepdims=True)
    return (x - mu) * lax.rsqrt(var + eps) * g + b


def _round_up(x, m):
    return ((x + m - 1) // m) * m


def _pick_divisor(total, candidates):
    for c in candidates:
        if c <= total and total % c == 0:
            return c
    return total


def _pick_head_block(n_head, d_head, target_lanes=256):
    """Largest divisor hb of n_head with hb*d_head <= max(target_lanes, d_head)."""
    hb = 1
    for c in range(1, n_head + 1):
        if n_head % c == 0 and c * d_head <= max(target_lanes, d_head):
            hb = c
    return hb


# ------------------------------------------------------- fused MHA (+LN/res) --

def _mha_kernel(xq_ref, xkv_ref, mask_ref, g_ref, b_ref,
                wq_ref, bq_ref, wkv_ref, bkv_ref, wo_ref, bo_ref,
                out_ref, attn_ref,
                xn_ref, acc_ref,
                *, hb, d_head, pre_ln, self_attn, eps, compute_dtype):
    j = pl.program_id(1)
    nb = pl.num_programs(1)

    # --- prologue (once per batch): LayerNorm (pre-LN) + accumulator init ----
    @pl.when(j == 0)
    def _init():
        x = xq_ref[0].astype(jnp.float32)                          # (Lq, D)
        xn_ref[...] = _ln(x, g_ref[...], b_ref[...], eps) if pre_ln else x
        acc_ref[...] = jnp.zeros_like(acc_ref)

    x_q = xn_ref[...].astype(compute_dtype)                        # (Lq, D)
    if self_attn:
        x_kv = x_q                                                 # no xkv DMA
    else:
        x_kv = xkv_ref[0].astype(compute_dtype)                    # (Lk, D)

    # --- head-blocked projections (scale pre-folded into wq/bq; K|V fused) ---
    q_all = jnp.dot(x_q, wq_ref[0],
                    preferred_element_type=jnp.float32) + bq_ref[0]    # (Lq, hb*dh)
    kv = jnp.dot(x_kv, wkv_ref[0],
                 preferred_element_type=jnp.float32) + bkv_ref[0]      # (Lk, 2*hb*dh)
    k_all = kv[:, :hb * d_head]
    v_all = kv[:, hb * d_head:]

    mask = mask_ref[0, 0].astype(jnp.float32)                      # (Lq, Lk)

    # --- per-head scores + softmax (dense (Lq, Lk) tiles), ctx collection ----
    ctx_parts = []
    for hh in range(hb):
        sl = slice(hh * d_head, (hh + 1) * d_head)
        qh = q_all[:, sl].astype(compute_dtype)
        kh = k_all[:, sl].astype(compute_dtype)
        vh = v_all[:, sl].astype(compute_dtype)
        s = lax.dot_general(qh, kh, (((1,), (1,)), ((), ())),
                            preferred_element_type=jnp.float32)    # (Lq, Lk)
        s = s + mask
        s = s - jnp.max(s, axis=-1, keepdims=True)
        p = jnp.exp(s)
        p = p / jnp.sum(p, axis=-1, keepdims=True)                 # exact normalize
        attn_ref[0, hh] = p.astype(attn_ref.dtype)
        ctx_parts.append(jnp.dot(p.astype(compute_dtype), vh,
                                 preferred_element_type=jnp.float32))
    ctx = jnp.concatenate(ctx_parts, axis=-1)                      # (Lq, hb*dh) f32

    # --- output projection, accumulated over head blocks ----------------------
    acc_ref[...] += jnp.dot(ctx.astype(compute_dtype), wo_ref[0],
                            preferred_element_type=jnp.float32)

    # --- epilogue (once per batch): bias + residual (+ post-LN) --------------
    @pl.when(j == nb - 1)
    def _finish():
        out = acc_ref[...] + bo_ref[...] + xq_ref[0].astype(jnp.float32)
        if not pre_ln:
            out = _ln(out, g_ref[...], b_ref[...], eps)
        out_ref[0] = out.astype(out_ref.dtype)


def multi_head_attention(xq, xkv, mask, params, ln_g, ln_b,
                         *, n_head, d_head, pre_ln, self_attn, eps=1e-5,
                         compute_dtype=jnp.bfloat16, attn_dtype=jnp.float32):
    """Fused (LN +) MHA (+ residual (+ LN)).

    xq: (B, Lq, D) query/residual input; xkv: (B, Lk, D) key/value input
    (untouched / not DMA'd when self_attn=True); mask: (B, 1, Lq, Lk) additive.
    Returns (out (B, Lq, D), attn_probs (B, n_head, Lq, Lk)).
    """
    B, Lq, D = xq.shape
    Lk = xkv.shape[1]
    inv_scale = 1.0 / (d_head ** 0.5)

    hb = _pick_head_block(n_head, d_head)
    nb = n_head // hb
    hd = hb * d_head

    # Head-block-major weight layout; fold 1/sqrt(d_head) into the query
    # projection (exact), fuse K|V weights/biases per head block.
    def hblock(w):  # (D, n_head*d_head) -> (nb, D, hb*d_head)
        return w.reshape(D, nb, hb, d_head).transpose(1, 0, 2, 3).reshape(nb, D, hd)

    wq_h = hblock(params["wq"] * inv_scale).astype(compute_dtype)
    bq_h = (params["bq"] * inv_scale).reshape(nb, 1, hd)
    wkv_h = jnp.concatenate([hblock(params["wk"]), hblock(params["wv"])],
                            axis=-1).astype(compute_dtype)              # (nb, D, 2hd)
    bkv_h = jnp.concatenate([params["bk"].reshape(nb, 1, hd),
                             params["bv"].reshape(nb, 1, hd)], axis=-1)  # (nb, 1, 2hd)
    wo_h = params["wo"].reshape(nb, hd, D).astype(compute_dtype)
    bo = params["bo"].reshape(1, D)
    g = ln_g.reshape(1, D)
    bta = ln_b.reshape(1, D)

    xkv_spec = (pl.BlockSpec(memory_space=pl.ANY) if self_attn
                else pl.BlockSpec((1, Lk, D), lambda i, j: (i, 0, 0)))

    kern = functools.partial(_mha_kernel, hb=hb, d_head=d_head, pre_ln=pre_ln,
                             self_attn=self_attn, eps=eps,
                             compute_dtype=compute_dtype)

    out, attn = pl.pallas_call(
        kern,
        grid=(B, nb),
        out_shape=(jax.ShapeDtypeStruct((B, Lq, D), xq.dtype),
                   jax.ShapeDtypeStruct((B, n_head, Lq, Lk), attn_dtype)),
        in_specs=[
            pl.BlockSpec((1, Lq, D), lambda i, j: (i, 0, 0)),           # xq (residual)
            xkv_spec,                                                   # xkv (ANY if self)
            pl.BlockSpec((1, 1, Lq, Lk), lambda i, j: (i, 0, 0, 0)),    # additive mask
            pl.BlockSpec((1, D), lambda i, j: (0, 0)),                  # LN gamma
            pl.BlockSpec((1, D), lambda i, j: (0, 0)),                  # LN beta
            pl.BlockSpec((1, D, hd), lambda i, j: (j, 0, 0)),           # wq (head block)
            pl.BlockSpec((1, 1, hd), lambda i, j: (j, 0, 0)),           # bq
            pl.BlockSpec((1, D, 2 * hd), lambda i, j: (j, 0, 0)),       # wk|wv fused
            pl.BlockSpec((1, 1, 2 * hd), lambda i, j: (j, 0, 0)),       # bk|bv fused
            pl.BlockSpec((1, hd, D), lambda i, j: (j, 0, 0)),           # wo (head block)
            pl.BlockSpec((1, D), lambda i, j: (0, 0)),                  # bo
        ],
        out_specs=(pl.BlockSpec((1, Lq, D), lambda i, j: (i, 0, 0)),
                   pl.BlockSpec((1, hb, Lq, Lk), lambda i, j: (i, j, 0, 0))),
        scratch_shapes=[pltpu.VMEM((Lq, D), jnp.float32),   # (LN'ed) query input
                        pltpu.VMEM((Lq, D), jnp.float32)],  # output accumulator
        compiler_params=pltpu.CompilerParams(
            dimension_semantics=("parallel", "arbitrary"),
            vmem_limit_bytes=_VMEM_LIMIT),
    )(xq, xkv, mask, g, bta, wq_h, bq_h, wkv_h, bkv_h, wo_h, bo)
    return out, attn


# ------------------------------------------------------- fused FFN (+LN/res) --

def _ffn_kernel(x_ref, g_ref, b_ref, w1_ref, b1_ref, w2_ref, b2_ref,
                o_ref, xn_ref, acc_ref, *, pre_ln, eps, compute_dtype):
    j = pl.program_id(1)

    @pl.when(j == 0)
    def _init():
        x = x_ref[...].astype(jnp.float32)
        xn_ref[...] = _ln(x, g_ref[...], b_ref[...], eps) if pre_ln else x
        acc_ref[...] = jnp.zeros_like(acc_ref)

    hdn = jnp.dot(xn_ref[...].astype(compute_dtype), w1_ref[...],
                  preferred_element_type=jnp.float32) + b1_ref[...]
    hdn = jnp.maximum(hdn, 0.0)
    acc_ref[...] += jnp.dot(hdn.astype(compute_dtype), w2_ref[...],
                            preferred_element_type=jnp.float32)

    @pl.when(j == pl.num_programs(1) - 1)
    def _finish():
        out = acc_ref[...] + b2_ref[...] + x_ref[...].astype(jnp.float32)
        if not pre_ln:
            out = _ln(out, g_ref[...], b_ref[...], eps)
        o_ref[...] = out.astype(o_ref.dtype)


def position_wise_ff(x, params, ln_g, ln_b, *, pre_ln, eps=1e-5,
                     compute_dtype=jnp.bfloat16,
                     block_rows=512, inner_block=512):
    """Fused (LN +) FFN (+ residual (+ LN)), tiled over rows and inner dim."""
    B, S, D = x.shape
    inner = params["w1"].shape[1]
    rows = B * S
    x2 = x.reshape(rows, D)

    # Row tile: bounded by block_rows, 8-aligned; pad rows so the tile divides.
    rt = min(block_rows, _round_up(rows, 8))
    rows_p = _round_up(rows, rt)
    if rows_p != rows:
        x2 = jnp.pad(x2, ((0, rows_p - rows), (0, 0)))
    it = _pick_divisor(inner, (inner_block, 512, 256, 128))

    w1 = params["w1"].astype(compute_dtype)
    w2 = params["w2"].astype(compute_dtype)

    kern = functools.partial(_ffn_kernel, pre_ln=pre_ln, eps=eps,
                             compute_dtype=compute_dtype)
    out = pl.pallas_call(
        kern,
        grid=(rows_p // rt, inner // it),
        out_shape=jax.ShapeDtypeStruct((rows_p, D), x.dtype),
        in_specs=[
            pl.BlockSpec((rt, D), lambda r, j: (r, 0)),     # x (resident across j)
            pl.BlockSpec((1, D), lambda r, j: (0, 0)),      # LN gamma
            pl.BlockSpec((1, D), lambda r, j: (0, 0)),      # LN beta
            pl.BlockSpec((D, it), lambda r, j: (0, j)),     # w1 tile (bf16)
            pl.BlockSpec((1, it), lambda r, j: (0, j)),     # b1 tile
            pl.BlockSpec((it, D), lambda r, j: (j, 0)),     # w2 tile (bf16)
            pl.BlockSpec((1, D), lambda r, j: (0, 0)),      # b2
        ],
        out_specs=pl.BlockSpec((rt, D), lambda r, j: (r, 0)),
        scratch_shapes=[pltpu.VMEM((rt, D), jnp.float32),   # (LN'ed) input
                        pltpu.VMEM((rt, D), jnp.float32)],  # accumulator
        compiler_params=pltpu.CompilerParams(
            dimension_semantics=("parallel", "arbitrary"),
            vmem_limit_bytes=_VMEM_LIMIT),
    )(x2, ln_g.reshape(1, D), ln_b.reshape(1, D),
      w1, params["b1"].reshape(1, inner), w2, params["b2"].reshape(1, D))
    return out[:rows].reshape(B, S, D)


# --------------------------------------------------------------- full layer --

def transformer_decoder_layer(params, decoder_x, decoder_mask, encoder_x, encoder_mask,
                              *, n_head, d_head, pre_ln,
                              compute_dtype=jnp.bfloat16):
    # Self-attention sub-layer (LN1 + MHA + residual fused).
    sa_out, dec_attn = multi_head_attention(
        decoder_x, decoder_x, decoder_mask, params["mha1"],
        params["ln1"]["g"], params["ln1"]["b"],
        n_head=n_head, d_head=d_head, pre_ln=pre_ln, self_attn=True,
        compute_dtype=compute_dtype)

    # Encoder-decoder attention sub-layer (LN2 + MHA + residual fused).
    ed_out, ed_attn = multi_head_attention(
        sa_out, encoder_x, encoder_mask, params["mha2"],
        params["ln2"]["g"], params["ln2"]["b"],
        n_head=n_head, d_head=d_head, pre_ln=pre_ln, self_attn=False,
        compute_dtype=compute_dtype)

    # Position-wise feed-forward sub-layer (LN3 + FFN + residual fused).
    out = position_wise_ff(ed_out, params["ffn"],
                           params["ln3"]["g"], params["ln3"]["b"], pre_ln=pre_ln,
                           compute_dtype=compute_dtype)
    return out, dec_attn, ed_attn


# ---------------------------------------------------------------- reference --

def _ref_layer_norm(x, g, b, eps=1e-5):
    mu = jnp.mean(x, axis=-1, keepdims=True)
    var = jnp.mean((x - mu) ** 2, axis=-1, keepdims=True)
    return (x - mu) / jnp.sqrt(var + eps) * g + b


def _ref_mha(xq, xkv, mask, p, n_head, d_head):
    B, Lq, D = xq.shape
    Lk = xkv.shape[1]
    q = xq @ p["wq"] + p["bq"]
    k = xkv @ p["wk"] + p["bk"]
    v = xkv @ p["wv"] + p["bv"]
    q = q.reshape(B, Lq, n_head, d_head).transpose(0, 2, 1, 3)
    k = k.reshape(B, Lk, n_head, d_head).transpose(0, 2, 1, 3)
    v = v.reshape(B, Lk, n_head, d_head).transpose(0, 2, 1, 3)
    s = jnp.einsum("bhqd,bhkd->bhqk", q, k) / (d_head ** 0.5) + mask
    a = jax.nn.softmax(s, axis=-1)
    ctx = jnp.einsum("bhqk,bhkd->bhqd", a, v)
    ctx = ctx.transpose(0, 2, 1, 3).reshape(B, Lq, n_head * d_head)
    return ctx @ p["wo"] + p["bo"], a


def _ref_layer(params, dx, dmask, ex, emask, n_head, d_head, pre_ln):
    ln1, ln2, ln3 = params["ln1"], params["ln2"], params["ln3"]
    if pre_ln:
        r = dx
        x = _ref_layer_norm(dx, ln1["g"], ln1["b"])
        sa, da = _ref_mha(x, x, dmask, params["mha1"], n_head, d_head)
        sa = sa + r
        r = sa
        x = _ref_layer_norm(sa, ln2["g"], ln2["b"])
        ea, eattn = _ref_mha(x, ex, emask, params["mha2"], n_head, d_head)
        ea = ea + r
        r = ea
        x = _ref_layer_norm(ea, ln3["g"], ln3["b"])
        h = jnp.maximum(x @ params["ffn"]["w1"] + params["ffn"]["b1"], 0.0)
        o = h @ params["ffn"]["w2"] + params["ffn"]["b2"]
        return o + r, da, eattn
    else:
        sa, da = _ref_mha(dx, dx, dmask, params["mha1"], n_head, d_head)
        sa = _ref_layer_norm(sa + dx, ln1["g"], ln1["b"])
        ea, eattn = _ref_mha(sa, ex, emask, params["mha2"], n_head, d_head)
        ea = _ref_layer_norm(ea + sa, ln2["g"], ln2["b"])
        h = jnp.maximum(ea @ params["ffn"]["w1"] + params["ffn"]["b1"], 0.0)
        o = h @ params["ffn"]["w2"] + params["ffn"]["b2"]
        return _ref_layer_norm(o + ea, ln3["g"], ln3["b"]), da, eattn


# -------------------------------------------------------------------- setup --

def _xavier(key, fan_in, fan_out):
    limit = math.sqrt(6.0 / (fan_in + fan_out))
    return jax.random.uniform(key, (fan_in, fan_out), jnp.float32, -limit, limit)


def init_params(key, hidden, inner, n_head, d_head):
    HD = n_head * d_head
    keys = jax.random.split(key, 16)

    def mha_params(ks):
        return {
            "wq": _xavier(ks[0], hidden, HD), "bq": jnp.zeros((HD,), jnp.float32),
            "wk": _xavier(ks[1], hidden, HD), "bk": jnp.zeros((HD,), jnp.float32),
            "wv": _xavier(ks[2], hidden, HD), "bv": jnp.zeros((HD,), jnp.float32),
            "wo": _xavier(ks[3], HD, hidden), "bo": jnp.zeros((hidden,), jnp.float32),
        }

    return {
        "ln1": {"g": jnp.ones((hidden,), jnp.float32), "b": jnp.zeros((hidden,), jnp.float32)},
        "ln2": {"g": jnp.ones((hidden,), jnp.float32), "b": jnp.zeros((hidden,), jnp.float32)},
        "ln3": {"g": jnp.ones((hidden,), jnp.float32), "b": jnp.zeros((hidden,), jnp.float32)},
        "mha1": mha_params(keys[0:4]),
        "mha2": mha_params(keys[4:8]),
        "ffn": {
            "w1": _xavier(keys[8], hidden, inner), "b1": jnp.zeros((inner,), jnp.float32),
            "w2": _xavier(keys[9], inner, hidden), "b2": jnp.zeros((hidden,), jnp.float32),
        },
    }


if __name__ == "__main__":
    B, Lq, Lk_enc = 2, 8, 16
    hidden, inner = 32, 64
    n_head, d_head = 4, 8

    key = jax.random.PRNGKey(0)
    k1, k2, k3 = jax.random.split(key, 3)

    params = init_params(k1, hidden, inner, n_head, d_head)
    decoder_x = jax.random.normal(k2, (B, Lq, hidden), jnp.float32)
    encoder_x = jax.random.normal(k3, (B, Lk_enc, hidden), jnp.float32)

    # causal additive mask for decoder self-attention, zero mask for enc-dec attention
    causal = jnp.where(jnp.tril(jnp.ones((Lq, Lq), jnp.bool_)), 0.0, -1e9).astype(jnp.float32)
    decoder_mask = jnp.broadcast_to(causal, (B, 1, Lq, Lq))
    encoder_mask = jnp.zeros((B, 1, Lq, Lk_enc), jnp.float32)

    # f32 compute -> tight tolerance (exact softmax normalization);
    # bf16 MXU feeds -> loose tolerance (bf16 operand rounding, f32 accumulate).
    for compute_dtype, tol in ((jnp.float32, 2e-3), (jnp.bfloat16, 1e-1)):
        for pre_ln in (True, False):
            fn = jax.jit(functools.partial(transformer_decoder_layer,
                                           n_head=n_head, d_head=d_head,
                                           pre_ln=pre_ln, compute_dtype=compute_dtype))
            out, dec_attn, enc_dec_attn = fn(params, decoder_x, decoder_mask,
                                             encoder_x, encoder_mask)
            jax.block_until_ready((out, dec_attn, enc_dec_attn))

            ro, rda, rea = _ref_layer(params, decoder_x, decoder_mask, encoder_x,
                                      encoder_mask, n_head, d_head, pre_ln)
            np.testing.assert_allclose(np.asarray(out), np.asarray(ro), rtol=tol, atol=tol)
            np.testing.assert_allclose(np.asarray(dec_attn), np.asarray(rda), rtol=tol, atol=tol)
            np.testing.assert_allclose(np.asarray(enc_dec_attn), np.asarray(rea), rtol=tol, atol=tol)

    print("KERNEL_OK")
</pallas_src>

<mosaic_0001>
module attributes {stable_mosaic.version = 11 : i64} {
  func.func @_mha_kernel(%arg0: i32, %arg1: i32, %arg2: memref<1x8x32xf32, #tpu.memory_space<vmem>>, %arg3: memref<2x8x32xf32, #tpu.memory_space<any>>, %arg4: memref<1x1x8x8xf32, #tpu.memory_space<vmem>>, %arg5: memref<1x32xf32, #tpu.memory_space<vmem>>, %arg6: memref<1x32xf32, #tpu.memory_space<vmem>>, %arg7: memref<1x32x32xf32, #tpu.memory_space<vmem>>, %arg8: memref<1x1x32xf32, #tpu.memory_space<vmem>>, %arg9: memref<1x32x64xf32, #tpu.memory_space<vmem>>, %arg10: memref<1x1x64xf32, #tpu.memory_space<vmem>>, %arg11: memref<1x32x32xf32, #tpu.memory_space<vmem>>, %arg12: memref<1x32xf32, #tpu.memory_space<vmem>>, %arg13: memref<1x8x32xf32, #tpu.memory_space<vmem>>, %arg14: memref<1x4x8x8xf32, #tpu.memory_space<vmem>>, %arg15: memref<8x32xf32, #tpu.memory_space<vmem>>, %arg16: memref<8x32xf32, #tpu.memory_space<vmem>>) attributes {dimension_semantics = [#tpu.dimension_semantics<parallel>, #tpu.dimension_semantics<arbitrary>], iteration_bounds = array<i64: 2, 1>, scalar_prefetch = 0 : i64, scratch_operands = 2 : i64, tpu.core_type = #tpu.core_type<tc>, window_params = [{transform_indices = @transform_0, window_bounds = array<i64: 1, 8, 32>}, {}, {transform_indices = @transform_2, window_bounds = array<i64: 1, 1, 8, 8>}, {pipeline_mode = #tpu.pipeline_mode<synchronous>, transform_indices = @transform_3, window_bounds = array<i64: 1, 32>}, {pipeline_mode = #tpu.pipeline_mode<synchronous>, transform_indices = @transform_4, window_bounds = array<i64: 1, 32>}, {transform_indices = @transform_5, window_bounds = array<i64: 1, 32, 32>}, {transform_indices = @transform_6, window_bounds = array<i64: 1, 1, 32>}, {transform_indices = @transform_7, window_bounds = array<i64: 1, 32, 64>}, {transform_indices = @transform_8, window_bounds = array<i64: 1, 1, 64>}, {transform_indices = @transform_9, window_bounds = array<i64: 1, 32, 32>}, {pipeline_mode = #tpu.pipeline_mode<synchronous>, transform_indices = @transform_10, window_bounds = array<i64: 1, 32>}, {transform_indices = @transform_11, window_bounds = array<i64: 1, 8, 32>}, {transform_indices = @transform_12, window_bounds = array<i64: 1, 4, 8, 8>}]} {
    %c0_i32 = arith.constant 0 : i32
    %0 = arith.cmpi eq, %arg1, %c0_i32 : i32
    %1 = arith.extui %0 : i1 to i32
    %c0_i32_0 = arith.constant 0 : i32
    %2 = arith.cmpi ne, %1, %c0_i32_0 : i32
    scf.if %2 {
      %c0_58 = arith.constant 0 : index
      %c0_59 = arith.constant 0 : index
      %c0_60 = arith.constant 0 : index
      %104 = vector.load %arg2[%c0_58, %c0_59, %c0_60] : memref<1x8x32xf32, #tpu.memory_space<vmem>>, vector<1x8x32xf32>
      %105 = vector.shape_cast %104 : vector<1x8x32xf32> to vector<8x32xf32>
      %c0_61 = arith.constant 0 : index
      %c0_62 = arith.constant 0 : index
      %106 = vector.load %arg5[%c0_61, %c0_62] : memref<1x32xf32, #tpu.memory_space<vmem>>, vector<1x32xf32>
      %c0_63 = arith.constant 0 : index
      %c0_64 = arith.constant 0 : index
      %107 = vector.load %arg6[%c0_63, %c0_64] : memref<1x32xf32, #tpu.memory_space<vmem>>, vector<1x32xf32>
      %cst_65 = arith.constant dense<0.000000e+00> : vector<8xf32>
      %108 = vector.multi_reduction <add>, %105, %cst_65 [1] : vector<8x32xf32> to vector<8xf32>
      %109 = vector.shape_cast %108 : vector<8xf32> to vector<8x1xf32>
      %cst_66 = arith.constant 3.200000e+01 : f32
      %110 = vector.broadcast %cst_66 : f32 to vector<8x1xf32>
      %111 = arith.divf %109, %110 : vector<8x1xf32>
      %112 = vector.broadcast %111 : vector<8x1xf32> to vector<8x32xf32>
      %113 = arith.subf %105, %112 : vector<8x32xf32>
      %114 = arith.mulf %113, %113 : vector<8x32xf32>
      %cst_67 = arith.constant dense<0.000000e+00> : vector<8xf32>
      %115 = vector.multi_reduction <add>, %114, %cst_67 [1] : vector<8x32xf32> to vector<8xf32>
      %116 = vector.shape_cast %115 : vector<8xf32> to vector<8x1xf32>
      %cst_68 = arith.constant 3.200000e+01 : f32
      %117 = vector.broadcast %cst_68 : f32 to vector<8x1xf32>
      %118 = arith.divf %116, %117 : vector<8x1xf32>
      %119 = vector.broadcast %111 : vector<8x1xf32> to vector<8x32xf32>
      %120 = arith.subf %105, %119 : vector<8x32xf32>
      %cst_69 = arith.constant 9.99999974E-6 : f32
      %121 = vector.broadcast %cst_69 : f32 to vector<8x1xf32>
      %122 = arith.addf %118, %121 : vector<8x1xf32>
      %123 = math.rsqrt %122 : vector<8x1xf32>
      %124 = vector.broadcast %123 : vector<8x1xf32> to vector<8x32xf32>
      %125 = arith.mulf %120, %124 : vector<8x32xf32>
      %126 = vector.broadcast %106 : vector<1x32xf32> to vector<8x32xf32>
      %127 = arith.mulf %125, %126 : vector<8x32xf32>
      %128 = vector.broadcast %107 : vector<1x32xf32> to vector<8x32xf32>
      %129 = arith.addf %127, %128 : vector<8x32xf32>
      %c0_70 = arith.constant 0 : index
      %c0_71 = arith.constant 0 : index
      %130 = vector.load %arg15[%c0_70, %c0_71] : memref<8x32xf32, #tpu.memory_space<vmem>>, vector<8x32xf32>
      tpu.vector_store %arg15[%c0_70, %c0_71], %129 {strides = array<i32>} : memref<8x32xf32, #tpu.memory_space<vmem>>, vector<8x32xf32>,
      %cst_72 = arith.constant 0.000000e+00 : f32
      %131 = vector.broadcast %cst_72 : f32 to vector<8x32xf32>
      %c0_73 = arith.constant 0 : index
      %c0_74 = arith.constant 0 : index
      %132 = vector.load %arg16[%c0_73, %c0_74] : memref<8x32xf32, #tpu.memory_space<vmem>>, vector<8x32xf32>
      tpu.vector_store %arg16[%c0_73, %c0_74], %131 {strides = array<i32>} : memref<8x32xf32, #tpu.memory_space<vmem>>, vector<8x32xf32>,
    } else {
    }
    %c0 = arith.constant 0 : index
    %c0_1 = arith.constant 0 : index
    %3 = vector.load %arg15[%c0, %c0_1] : memref<8x32xf32, #tpu.memory_space<vmem>>, vector<8x32xf32>
    %c0_2 = arith.constant 0 : index
    %c0_3 = arith.constant 0 : index
    %c0_4 = arith.constant 0 : index
    %4 = vector.load %arg7[%c0_2, %c0_3, %c0_4] : memref<1x32x32xf32, #tpu.memory_space<vmem>>, vector<1x32x32xf32>
    %5 = vector.shape_cast %4 : vector<1x32x32xf32> to vector<32x32xf32>
    %cst = arith.constant dense<0.000000e+00> : vector<8x32xf32>
    %6 = tpu.matmul %3, %5, %cst {dimension_numbers = #tpu.dot_dimension_numbers<[1], [0], [0], [1], [0, 0, 1, 1], [], []>} : vector<8x32xf32>, vector<32x32xf32>, vector<8x32xf32> -> vector<8x32xf32>
    %c0_5 = arith.constant 0 : index
    %c0_6 = arith.constant 0 : index
    %c0_7 = arith.constant 0 : index
    %7 = vector.load %arg8[%c0_5, %c0_6, %c0_7] : memref<1x1x32xf32, #tpu.memory_space<vmem>>, vector<1x1x32xf32>
    %8 = vector.shape_cast %7 : vector<1x1x32xf32> to vector<1x32xf32>
    %9 = vector.broadcast %8 : vector<1x32xf32> to vector<8x32xf32>
    %10 = arith.addf %6, %9 : vector<8x32xf32>
    %c0_8 = arith.constant 0 : index
    %c0_9 = arith.constant 0 : index
    %c0_10 = arith.constant 0 : index
    %11 = vector.load %arg9[%c0_8, %c0_9, %c0_10] : memref<1x32x64xf32, #tpu.memory_space<vmem>>, vector<1x32x64xf32>
    %12 = vector.shape_cast %11 : vector<1x32x64xf32> to vector<32x64xf32>
    %cst_11 = arith.constant dense<0.000000e+00> : vector<8x64xf32>
    %13 = tpu.matmul %3, %12, %cst_11 {dimension_numbers = #tpu.dot_dimension_numbers<[1], [0], [0], [1], [0, 0, 1, 1], [], []>} : vector<8x32xf32>, vector<32x64xf32>, vector<8x64xf32> -> vector<8x64xf32>
    %c0_12 = arith.constant 0 : index
    %c0_13 = arith.constant 0 : index
    %c0_14 = arith.constant 0 : index
    %14 = vector.load %arg10[%c0_12, %c0_13, %c0_14] : memref<1x1x64xf32, #tpu.memory_space<vmem>>, vector<1x1x64xf32>
    %15 = vector.shape_cast %14 : vector<1x1x64xf32> to vector<1x64xf32>
    %16 = vector.broadcast %15 : vector<1x64xf32> to vector<8x64xf32>
    %17 = arith.addf %13, %16 : vector<8x64xf32>
    %18 = vector.extract_strided_slice %17 {offsets = [0, 0], sizes = [8, 32], strides = [1, 1]} : vector<8x64xf32> to vector<8x32xf32>
    %19 = vector.extract_strided_slice %17 {offsets = [0, 32], sizes = [8, 32], strides = [1, 1]} : vector<8x64xf32> to vector<8x32xf32>
    %c0_15 = arith.constant 0 : index
    %c0_16 = arith.constant 0 : index
    %c0_17 = arith.constant 0 : index
    %c0_18 = arith.constant 0 : index
    %20 = vector.load %arg4[%c0_15, %c0_16, %c0_17, %c0_18] : memref<1x1x8x8xf32, #tpu.memory_space<vmem>>, vector<1x1x8x8xf32>
    %21 = vector.shape_cast %20 : vector<1x1x8x8xf32> to vector<8x8xf32>
    %22 = vector.extract_strided_slice %10 {offsets = [0, 0], sizes = [8, 8], strides = [1, 1]} : vector<8x32xf32> to vector<8x8xf32>
    %23 = vector.extract_strided_slice %18 {offsets = [0, 0], sizes = [8, 8], strides = [1, 1]} : vector<8x32xf32> to vector<8x8xf32>
    %24 = vector.extract_strided_slice %19 {offsets = [0, 0], sizes = [8, 8], strides = [1, 1]} : vector<8x32xf32> to vector<8x8xf32>
    %cst_19 = arith.constant dense<0.000000e+00> : vector<8x8xf32>
    %25 = tpu.matmul %22, %23, %cst_19 {dimension_numbers = #tpu.dot_dimension_numbers<[1], [1], [0], [0], [0, 0, 1, 0], [], []>} : vector<8x8xf32>, vector<8x8xf32>, vector<8x8xf32> -> vector<8x8xf32>
    %26 = arith.addf %25, %21 : vector<8x8xf32>
    %cst_20 = arith.constant dense<0xFF800000> : vector<8xf32>
    %27 = vector.multi_reduction <maximumf>, %26, %cst_20 [1] : vector<8x8xf32> to vector<8xf32>
    %28 = vector.shape_cast %27 : vector<8xf32> to vector<8x1xf32>
    %29 = vector.broadcast %28 : vector<8x1xf32> to vector<8x8xf32>
    %30 = arith.subf %26, %29 : vector<8x8xf32>
    %31 = math.exp %30 : vector<8x8xf32>
    %cst_21 = arith.constant dense<0.000000e+00> : vector<8xf32>
    %32 = vector.multi_reduction <add>, %31, %cst_21 [1] : vector<8x8xf32> to vector<8xf32>
    %33 = vector.shape_cast %32 : vector<8xf32> to vector<8x1xf32>
    %34 = vector.broadcast %33 : vector<8x1xf32> to vector<8x8xf32>
    %35 = arith.divf %31, %34 : vector<8x8xf32>
    %c0_22 = arith.constant 0 : index
    %c0_23 = arith.constant 0 : index
    %c0_24 = arith.constant 0 : index
    %c0_25 = arith.constant 0 : index
    %36 = vector.load %arg14[%c0_22, %c0_23, %c0_24, %c0_25] : memref<1x4x8x8xf32, #tpu.memory_space<vmem>>, vector<1x1x8x8xf32>
    %37 = vector.shape_cast %36 : vector<1x1x8x8xf32> to vector<8x8xf32>
    %38 = vector.shape_cast %35 : vector<8x8xf32> to vector<1x1x8x8xf32>
    tpu.vector_store %arg14[%c0_22, %c0_23, %c0_24, %c0_25], %38 {strides = array<i32>} : memref<1x4x8x8xf32, #tpu.memory_space<vmem>>, vector<1x1x8x8xf32>,
    %cst_26 = arith.constant dense<0.000000e+00> : vector<8x8xf32>
    %39 = tpu.matmul %35, %24, %cst_26 {dimension_numbers = #tpu.dot_dimension_numbers<[1], [0], [0], [1], [0, 0, 1, 1], [], []>} : vector<8x8xf32>, vector<8x8xf32>, vector<8x8xf32> -> vector<8x8xf32>
    %40 = vector.extract_strided_slice %10 {offsets = [0, 8], sizes = [8, 8], strides = [1, 1]} : vector<8x32xf32> to vector<8x8xf32>
    %41 = vector.extract_strided_slice %18 {offsets = [0, 8], sizes = [8, 8], strides = [1, 1]} : vector<8x32xf32> to vector<8x8xf32>
    %42 = vector.extract_strided_slice %19 {offsets = [0, 8], sizes = [8, 8], strides = [1, 1]} : vector<8x32xf32> to vector<8x8xf32>
    %cst_27 = arith.constant dense<0.000000e+00> : vector<8x8xf32>
    %43 = tpu.matmul %40, %41, %cst_27 {dimension_numbers = #tpu.dot_dimension_numbers<[1], [1], [0], [0], [0, 0, 1, 0], [], []>} : vector<8x8xf32>, vector<8x8xf32>, vector<8x8xf32> -> vector<8x8xf32>
    %44 = arith.addf %43, %21 : vector<8x8xf32>
    %cst_28 = arith.constant dense<0xFF800000> : vector<8xf32>
    %45 = vector.multi_reduction <maximumf>, %44, %cst_28 [1] : vector<8x8xf32> to vector<8xf32>
    %46 = vector.shape_cast %45 : vector<8xf32> to vector<8x1xf32>
    %47 = vector.broadcast %46 : vector<8x1xf32> to vector<8x8xf32>
    %48 = arith.subf %44, %47 : vector<8x8xf32>
    %49 = math.exp %48 : vector<8x8xf32>
    %cst_29 = arith.constant dense<0.000000e+00> : vector<8xf32>
    %50 = vector.multi_reduction <add>, %49, %cst_29 [1] : vector<8x8xf32> to vector<8xf32>
    %51 = vector.shape_cast %50 : vector<8xf32> to vector<8x1xf32>
    %52 = vector.broadcast %51 : vector<8x1xf32> to vector<8x8xf32>
    %53 = arith.divf %49, %52 : vector<8x8xf32>
    %c0_30 = arith.constant 0 : index
    %c1 = arith.constant 1 : index
    %c0_31 = arith.constant 0 : index
    %c0_32 = arith.constant 0 : index
    %54 = vector.load %arg14[%c0_30, %c1, %c0_31, %c0_32] : memref<1x4x8x8xf32, #tpu.memory_space<vmem>>, vector<1x1x8x8xf32>
    %55 = vector.shape_cast %54 : vector<1x1x8x8xf32> to vector<8x8xf32>
    %56 = vector.shape_cast %53 : vector<8x8xf32> to vector<1x1x8x8xf32>
    tpu.vector_store %arg14[%c0_30, %c1, %c0_31, %c0_32], %56 {strides = array<i32>} : memref<1x4x8x8xf32, #tpu.memory_space<vmem>>, vector<1x1x8x8xf32>,
    %cst_33 = arith.constant dense<0.000000e+00> : vector<8x8xf32>
    %57 = tpu.matmul %53, %42, %cst_33 {dimension_numbers = #tpu.dot_dimension_numbers<[1], [0], [0], [1], [0, 0, 1, 1], [], []>} : vector<8x8xf32>, vector<8x8xf32>, vector<8x8xf32> -> vector<8x8xf32>
    %58 = vector.extract_strided_slice %10 {offsets = [0, 16], sizes = [8, 8], strides = [1, 1]} : vector<8x32xf32> to vector<8x8xf32>
    %59 = vector.extract_strided_slice %18 {offsets = [0, 16], sizes = [8, 8], strides = [1, 1]} : vector<8x32xf32> to vector<8x8xf32>
    %60 = vector.extract_strided_slice %19 {offsets = [0, 16], sizes = [8, 8], strides = [1, 1]} : vector<8x32xf32> to vector<8x8xf32>
    %cst_34 = arith.constant dense<0.000000e+00> : vector<8x8xf32>
    %61 = tpu.matmul %58, %59, %cst_34 {dimension_numbers = #tpu.dot_dimension_numbers<[1], [1], [0], [0], [0, 0, 1, 0], [], []>} : vector<8x8xf32>, vector<8x8xf32>, vector<8x8xf32> -> vector<8x8xf32>
    %62 = arith.addf %61, %21 : vector<8x8xf32>
    %cst_35 = arith.constant dense<0xFF800000> : vector<8xf32>
    %63 = vector.multi_reduction <maximumf>, %62, %cst_35 [1] : vector<8x8xf32> to vector<8xf32>
    %64 = vector.shape_cast %63 : vector<8xf32> to vector<8x1xf32>
    %65 = vector.broadcast %64 : vector<8x1xf32> to vector<8x8xf32>
    %66 = arith.subf %62, %65 : vector<8x8xf32>
    %67 = math.exp %66 : vector<8x8xf32>
    %cst_36 = arith.constant dense<0.000000e+00> : vector<8xf32>
    %68 = vector.multi_reduction <add>, %67, %cst_36 [1] : vector<8x8xf32> to vector<8xf32>
    %69 = vector.shape_cast %68 : vector<8xf32> to vector<8x1xf32>
    %70 = vector.broadcast %69 : vector<8x1xf32> to vector<8x8xf32>
    %71 = arith.divf %67, %70 : vector<8x8xf32>
    %c0_37 = arith.constant 0 : index
    %c2 = arith.constant 2 : index
    %c0_38 = arith.constant 0 : index
    %c0_39 = arith.constant 0 : index
    %72 = vector.load %arg14[%c0_37, %c2, %c0_38, %c0_39] : memref<1x4x8x8xf32, #tpu.memory_space<vmem>>, vector<1x1x8x8xf32>
    %73 = vector.shape_cast %72 : vector<1x1x8x8xf32> to vector<8x8xf32>
    %74 = vector.shape_cast %71 : vector<8x8xf32> to vector<1x1x8x8xf32>
    tpu.vector_store %arg14[%c0_37, %c2, %c0_38, %c0_39], %74 {strides = array<i32>} : memref<1x4x8x8xf32, #tpu.memory_space<vmem>>, vector<1x1x8x8xf32>,
    %cst_40 = arith.constant dense<0.000000e+00> : vector<8x8xf32>
    %75 = tpu.matmul %71, %60, %cst_40 {dimension_numbers = #tpu.dot_dimension_numbers<[1], [0], [0], [1], [0, 0, 1, 1], [], []>} : vector<8x8xf32>, vector<8x8xf32>, vector<8x8xf32> -> vector<8x8xf32>
    %76 = vector.extract_strided_slice %10 {offsets = [0, 24], sizes = [8, 8], strides = [1, 1]} : vector<8x32xf32> to vector<8x8xf32>
    %77 = vector.extract_strided_slice %18 {offsets = [0, 24], sizes = [8, 8], strides = [1, 1]} : vector<8x32xf32> to vector<8x8xf32>
    %78 = vector.extract_strided_slice %19 {offsets = [0, 24], sizes = [8, 8], strides = [1, 1]} : vector<8x32xf32> to vector<8x8xf32>
    %cst_41 = arith.constant dense<0.000000e+00> : vector<8x8xf32>
    %79 = tpu.matmul %76, %77, %cst_41 {dimension_numbers = #tpu.dot_dimension_numbers<[1], [1], [0], [0], [0, 0, 1, 0], [], []>} : vector<8x8xf32>, vector<8x8xf32>, vector<8x8xf32> -> vector<8x8xf32>
    %80 = arith.addf %79, %21 : vector<8x8xf32>
    %cst_42 = arith.constant dense<0xFF800000> : vector<8xf32>
    %81 = vector.multi_reduction <maximumf>, %80, %cst_42 [1] : vector<8x8xf32> to vector<8xf32>
    %82 = vector.shape_cast %81 : vector<8xf32> to vector<8x1xf32>
    %83 = vector.broadcast %82 : vector<8x1xf32> to vector<8x8xf32>
    %84 = arith.subf %80, %83 : vector<8x8xf32>
    %85 = math.exp %84 : vector<8x8xf32>
    %cst_43 = arith.constant dense<0.000000e+00> : vector<8xf32>
    %86 = vector.multi_reduction <add>, %85, %cst_43 [1] : vector<8x8xf32> to vector<8xf32>
    %87 = vector.shape_cast %86 : vector<8xf32> to vector<8x1xf32>
    %88 = vector.broadcast %87 : vector<8x1xf32> to vector<8x8xf32>
    %89 = arith.divf %85, %88 : vector<8x8xf32>
    %c0_44 = arith.constant 0 : index
    %c3 = arith.constant 3 : index
    %c0_45 = arith.constant 0 : index
    %c0_46 = arith.constant 0 : index
    %90 = vector.load %arg14[%c0_44, %c3, %c0_45, %c0_46] : memref<1x4x8x8xf32, #tpu.memory_space<vmem>>, vector<1x1x8x8xf32>
    %91 = vector.shape_cast %90 : vector<1x1x8x8xf32> to vector<8x8xf32>
    %92 = vector.shape_cast %89 : vector<8x8xf32> to vector<1x1x8x8xf32>
    tpu.vector_store %arg14[%c0_44, %c3, %c0_45, %c0_46], %92 {strides = array<i32>} : memref<1x4x8x8xf32, #tpu.memory_space<vmem>>, vector<1x1x8x8xf32>,
    %cst_47 = arith.constant dense<0.000000e+00> : vector<8x8xf32>
    %93 = tpu.matmul %89, %78, %cst_47 {dimension_numbers = #tpu.dot_dimension_numbers<[1], [0], [0], [1], [0, 0, 1, 1], [], []>} : vector<8x8xf32>, vector<8x8xf32>, vector<8x8xf32> -> vector<8x8xf32>
    %94 = tpu.concatenate %39, %57, %75, %93 in 1 : vector<8x8xf32>, vector<8x8xf32>, vector<8x8xf32>, vector<8x8xf32> -> vector<8x32xf32>
    %c0_48 = arith.constant 0 : index
    %c0_49 = arith.constant 0 : index
    %95 = vector.load %arg16[%c0_48, %c0_49] : memref<8x32xf32, #tpu.memory_space<vmem>>, vector<8x32xf32>
    %c0_50 = arith.constant 0 : index
    %c0_51 = arith.constant 0 : index
    %c0_52 = arith.constant 0 : index
    %96 = vector.load %arg11[%c0_50, %c0_51, %c0_52] : memref<1x32x32xf32, #tpu.memory_space<vmem>>, vector<1x32x32xf32>
    %97 = vector.shape_cast %96 : vector<1x32x32xf32> to vector<32x32xf32>
    %cst_53 = arith.constant dense<0.000000e+00> : vector<8x32xf32>
    %98 = tpu.matmul %94, %97, %cst_53 {dimension_numbers = #tpu.dot_dimension_numbers<[1], [0], [0], [1], [0, 0, 1, 1], [], []>} : vector<8x32xf32>, vector<32x32xf32>, vector<8x32xf32> -> vector<8x32xf32>
    %99 = arith.addf %95, %98 : vector<8x32xf32>
    %c0_54 = arith.constant 0 : index
    %c0_55 = arith.constant 0 : index
    %100 = vector.load %arg16[%c0_54, %c0_55] : memref<8x32xf32, #tpu.memory_space<vmem>>, vector<8x32xf32>
    tpu.vector_store %arg16[%c0_54, %c0_55], %99 {strides = array<i32>} : memref<8x32xf32, #tpu.memory_space<vmem>>, vector<8x32xf32>,
    %c0_i32_56 = arith.constant 0 : i32
    %101 = arith.cmpi eq, %arg1, %c0_i32_56 : i32
    %102 = arith.extui %101 : i1 to i32
    %c0_i32_57 = arith.constant 0 : i32
    %103 = arith.cmpi ne, %102, %c0_i32_57 : i32
    scf.if %103 {
      %c0_58 = arith.constant 0 : index
      %c0_59 = arith.constant 0 : index
      %104 = vector.load %arg16[%c0_58, %c0_59] : memref<8x32xf32, #tpu.memory_space<vmem>>, vector<8x32xf32>
      %c0_60 = arith.constant 0 : index
      %c0_61 = arith.constant 0 : index
      %105 = vector.load %arg12[%c0_60, %c0_61] : memref<1x32xf32, #tpu.memory_space<vmem>>, vector<1x32xf32>
      %106 = vector.broadcast %105 : vector<1x32xf32> to vector<8x32xf32>
      %107 = arith.addf %104, %106 : vector<8x32xf32>
      %c0_62 = arith.constant 0 : index
      %c0_63 = arith.constant 0 : index
      %c0_64 = arith.constant 0 : index
      %108 = vector.load %arg2[%c0_62, %c0_63, %c0_64] : memref<1x8x32xf32, #tpu.memory_space<vmem>>, vector<1x8x32xf32>
      %109 = vector.shape_cast %108 : vector<1x8x32xf32> to vector<8x32xf32>
      %110 = arith.addf %107, %109 : vector<8x32xf32>
      %c0_65 = arith.constant 0 : index
      %c0_66 = arith.constant 0 : index
      %c0_67 = arith.constant 0 : index
      %111 = vector.load %arg13[%c0_65, %c0_66, %c0_67] : memref<1x8x32xf32, #tpu.memory_space<vmem>>, vector<1x8x32xf32>
      %112 = vector.shape_cast %111 : vector<1x8x32xf32> to vector<8x32xf32>
      %113 = vector.shape_cast %110 : vector<8x32xf32> to vector<1x8x32xf32>
      tpu.vector_store %arg13[%c0_65, %c0_66, %c0_67], %113 {strides = array<i32>} : memref<1x8x32xf32, #tpu.memory_space<vmem>>, vector<1x8x32xf32>,
    } else {
    }
    return
  }
  func.func @transform_0(%arg0: i32, %arg1: i32) -> (i32, i32, i32) {
    %c0_i32 = arith.constant 0 : i32
    %c0_i32_0 = arith.constant 0 : i32
    %c0_i32_1 = arith.constant 0 : i32
    return %arg0, %c0_i32, %c0_i32_0 : i32, i32, i32
  }
  func.func @transform_2(%arg0: i32, %arg1: i32) -> (i32, i32, i32, i32) {
    %c0_i32 = arith.constant 0 : i32
    %c0_i32_0 = arith.constant 0 : i32
    %c0_i32_1 = arith.constant 0 : i32
    %c0_i32_2 = arith.constant 0 : i32
    return %arg0, %c0_i32, %c0_i32_0, %c0_i32_1 : i32, i32, i32, i32
  }
  func.func @transform_3(%arg0: i32, %arg1: i32) -> (i32, i32) {
    %c0_i32 = arith.constant 0 : i32
    %c0_i32_0 = arith.constant 0 : i32
    %c0_i32_1 = arith.constant 0 : i32
    return %c0_i32, %c0_i32_0 : i32, i32
  }
  func.func @transform_4(%arg0: i32, %arg1: i32) -> (i32, i32) {
    %c0_i32 = arith.constant 0 : i32
    %c0_i32_0 = arith.constant 0 : i32
    %c0_i32_1 = arith.constant 0 : i32
    return %c0_i32, %c0_i32_0 : i32, i32
  }
  func.func @transform_5(%arg0: i32, %arg1: i32) -> (i32, i32, i32) {
    %c0_i32 = arith.constant 0 : i32
    %c0_i32_0 = arith.constant 0 : i32
    %c0_i32_1 = arith.constant 0 : i32
    return %arg1, %c0_i32, %c0_i32_0 : i32, i32, i32
  }
  func.func @transform_6(%arg0: i32, %arg1: i32) -> (i32, i32, i32) {
    %c0_i32 = arith.constant 0 : i32
    %c0_i32_0 = arith.constant 0 : i32
    %c0_i32_1 = arith.constant 0 : i32
    return %arg1, %c0_i32, %c0_i32_0 : i32, i32, i32
  }
  func.func @transform_7(%arg0: i32, %arg1: i32) -> (i32, i32, i32) {
    %c0_i32 = arith.constant 0 : i32
    %c0_i32_0 = arith.constant 0 : i32
    %c0_i32_1 = arith.constant 0 : i32
    return %arg1, %c0_i32, %c0_i32_0 : i32, i32, i32
  }
  func.func @transform_8(%arg0: i32, %arg1: i32) -> (i32, i32, i32) {
    %c0_i32 = arith.constant 0 : i32
    %c0_i32_0 = arith.constant 0 : i32
    %c0_i32_1 = arith.constant 0 : i32
    return %arg1, %c0_i32, %c0_i32_0 : i32, i32, i32
  }
  func.func @transform_9(%arg0: i32, %arg1: i32) -> (i32, i32, i32) {
    %c0_i32 = arith.constant 0 : i32
    %c0_i32_0 = arith.constant 0 : i32
    %c0_i32_1 = arith.constant 0 : i32
    return %arg1, %c0_i32, %c0_i32_0 : i32, i32, i32
  }
  func.func @transform_10(%arg0: i32, %arg1: i32) -> (i32, i32) {
    %c0_i32 = arith.constant 0 : i32
    %c0_i32_0 = arith.constant 0 : i32
    %c0_i32_1 = arith.constant 0 : i32
    return %c0_i32, %c0_i32_0 : i32, i32
  }
  func.func @transform_11(%arg0: i32, %arg1: i32) -> (i32, i32, i32) {
    %c0_i32 = arith.constant 0 : i32
    %c0_i32_0 = arith.constant 0 : i32
    %c0_i32_1 = arith.constant 0 : i32
    return %arg0, %c0_i32, %c0_i32_0 : i32, i32, i32
  }
  func.func @transform_12(%arg0: i32, %arg1: i32) -> (i32, i32, i32, i32) {
    %c0_i32 = arith.constant 0 : i32
    %c0_i32_0 = arith.constant 0 : i32
    %c0_i32_1 = arith.constant 0 : i32
    return %arg0, %arg1, %c0_i32, %c0_i32_0 : i32, i32, i32, i32
  }
}

module attributes {stable_mosaic.version = 11 : i64} {
  func.func @_mha_kernel(%arg0: i32, %arg1: i32, %arg2: memref<1x8x32xf32, #tpu.memory_space<vmem>>, %arg3: memref<1x16x32xf32, #tpu.memory_space<vmem>>, %arg4: memref<1x1x8x16xf32, #tpu.memory_space<vmem>>, %arg5: memref<1x32xf32, #tpu.memory_space<vmem>>, %arg6: memref<1x32xf32, #tpu.memory_space<vmem>>, %arg7: memref<1x32x32xf32, #tpu.memory_space<vmem>>, %arg8: memref<1x1x32xf32, #tpu.memory_space<vmem>>, %arg9: memref<1x32x64xf32, #tpu.memory_space<vmem>>, %arg10: memref<1x1x64xf32, #tpu.memory_space<vmem>>, %arg11: memref<1x32x32xf32, #tpu.memory_space<vmem>>, %arg12: memref<1x32xf32, #tpu.memory_space<vmem>>, %arg13: memref<1x8x32xf32, #tpu.memory_space<vmem>>, %arg14: memref<1x4x8x16xf32, #tpu.memory_space<vmem>>, %arg15: memref<8x32xf32, #tpu.memory_space<vmem>>, %arg16: memref<8x32xf32, #tpu.memory_space<vmem>>) attributes {dimension_semantics = [#tpu.dimension_semantics<parallel>, #tpu.dimension_semantics<arbitrary>], iteration_bounds = array<i64: 2, 1>, scalar_prefetch = 0 : i64, scratch_operands = 2 : i64, tpu.core_type = #tpu.core_type<tc>, window_params = [{transform_indices = @transform_0, window_bounds = array<i64: 1, 8, 32>}, {transform_indices = @transform_1, window_bounds = array<i64: 1, 16, 32>}, {transform_indices = @transform_2, window_bounds = array<i64: 1, 1, 8, 16>}, {pipeline_mode = #tpu.pipeline_mode<synchronous>, transform_indices = @transform_3, window_bounds = array<i64: 1, 32>}, {pipeline_mode = #tpu.pipeline_mode<synchronous>, transform_indices = @transform_4, window_bounds = array<i64: 1, 32>}, {transform_indices = @transform_5, window_bounds = array<i64: 1, 32, 32>}, {transform_indices = @transform_6, window_bounds = array<i64: 1, 1, 32>}, {transform_indices = @transform_7, window_bounds = array<i64: 1, 32, 64>}, {transform_indices = @transform_8, window_bounds = array<i64: 1, 1, 64>}, {transform_indices = @transform_9, window_bounds = array<i64: 1, 32, 32>}, {pipeline_mode = #tpu.pipeline_mode<synchronous>, transform_indices = @transform_10, window_bounds = array<i64: 1, 32>}, {transform_indices = @transform_11, window_bounds = array<i64: 1, 8, 32>}, {transform_indices = @transform_12, window_bounds = array<i64: 1, 4, 8, 16>}]} {
    %c0_i32 = arith.constant 0 : i32
    %0 = arith.cmpi eq, %arg1, %c0_i32 : i32
    %1 = arith.extui %0 : i1 to i32
    %c0_i32_0 = arith.constant 0 : i32
    %2 = arith.cmpi ne, %1, %c0_i32_0 : i32
    scf.if %2 {
      %c0_61 = arith.constant 0 : index
      %c0_62 = arith.constant 0 : index
      %c0_63 = arith.constant 0 : index
      %106 = vector.load %arg2[%c0_61, %c0_62, %c0_63] : memref<1x8x32xf32, #tpu.memory_space<vmem>>, vector<1x8x32xf32>
      %107 = vector.shape_cast %106 : vector<1x8x32xf32> to vector<8x32xf32>
      %c0_64 = arith.constant 0 : index
      %c0_65 = arith.constant 0 : index
      %108 = vector.load %arg5[%c0_64, %c0_65] : memref<1x32xf32, #tpu.memory_space<vmem>>, vector<1x32xf32>
      %c0_66 = arith.constant 0 : index
      %c0_67 = arith.constant 0 : index
      %109 = vector.load %arg6[%c0_66, %c0_67] : memref<1x32xf32, #tpu.memory_space<vmem>>, vector<1x32xf32>
      %cst_68 = arith.constant dense<0.000000e+00> : vector<8xf32>
      %110 = vector.multi_reduction <add>, %107, %cst_68 [1] : vector<8x32xf32> to vector<8xf32>
      %111 = vector.shape_cast %110 : vector<8xf32> to vector<8x1xf32>
      %cst_69 = arith.constant 3.200000e+01 : f32
      %112 = vector.broadcast %cst_69 : f32 to vector<8x1xf32>
      %113 = arith.divf %111, %112 : vector<8x1xf32>
      %114 = vector.broadcast %113 : vector<8x1xf32> to vector<8x32xf32>
      %115 = arith.subf %107, %114 : vector<8x32xf32>
      %116 = arith.mulf %115, %115 : vector<8x32xf32>
      %cst_70 = arith.constant dense<0.000000e+00> : vector<8xf32>
      %117 = vector.multi_reduction <add>, %116, %cst_70 [1] : vector<8x32xf32> to vector<8xf32>
      %118 = vector.shape_cast %117 : vector<8xf32> to vector<8x1xf32>
      %cst_71 = arith.constant 3.200000e+01 : f32
      %119 = vector.broadcast %cst_71 : f32 to vector<8x1xf32>
      %120 = arith.divf %118, %119 : vector<8x1xf32>
      %121 = vector.broadcast %113 : vector<8x1xf32> to vector<8x32xf32>
      %122 = arith.subf %107, %121 : vector<8x32xf32>
      %cst_72 = arith.constant 9.99999974E-6 : f32
      %123 = vector.broadcast %cst_72 : f32 to vector<8x1xf32>
      %124 = arith.addf %120, %123 : vector<8x1xf32>
      %125 = math.rsqrt %124 : vector<8x1xf32>
      %126 = vector.broadcast %125 : vector<8x1xf32> to vector<8x32xf32>
      %127 = arith.mulf %122, %126 : vector<8x32xf32>
      %128 = vector.broadcast %108 : vector<1x32xf32> to vector<8x32xf32>
      %129 = arith.mulf %127, %128 : vector<8x32xf32>
      %130 = vector.broadcast %109 : vector<1x32xf32> to vector<8x32xf32>
      %131 = arith.addf %129, %130 : vector<8x32xf32>
      %c0_73 = arith.constant 0 : index
      %c0_74 = arith.constant 0 : index
      %132 = vector.load %arg15[%c0_73, %c0_74] : memref<8x32xf32, #tpu.memory_space<vmem>>, vector<8x32xf32>
      tpu.vector_store %arg15[%c0_73, %c0_74], %131 {strides = array<i32>} : memref<8x32xf32, #tpu.memory_space<vmem>>, vector<8x32xf32>,
      %cst_75 = arith.constant 0.000000e+00 : f32
      %133 = vector.broadcast %cst_75 : f32 to vector<8x32xf32>
      %c0_76 = arith.constant 0 : index
      %c0_77 = arith.constant 0 : index
      %134 = vector.load %arg16[%c0_76, %c0_77] : memref<8x32xf32, #tpu.memory_space<vmem>>, vector<8x32xf32>
      tpu.vector_store %arg16[%c0_76, %c0_77], %133 {strides = array<i32>} : memref<8x32xf32, #tpu.memory_space<vmem>>, vector<8x32xf32>,
    } else {
    }
    %c0 = arith.constant 0 : index
    %c0_1 = arith.constant 0 : index
    %3 = vector.load %arg15[%c0, %c0_1] : memref<8x32xf32, #tpu.memory_space<vmem>>, vector<8x32xf32>
    %c0_2 = arith.constant 0 : index
    %c0_3 = arith.constant 0 : index
    %c0_4 = arith.constant 0 : index
    %4 = vector.load %arg3[%c0_2, %c0_3, %c0_4] : memref<1x16x32xf32, #tpu.memory_space<vmem>>, vector<1x16x32xf32>
    %5 = vector.shape_cast %4 : vector<1x16x32xf32> to vector<16x32xf32>
    %c0_5 = arith.constant 0 : index
    %c0_6 = arith.constant 0 : index
    %c0_7 = arith.constant 0 : index
    %6 = vector.load %arg7[%c0_5, %c0_6, %c0_7] : memref<1x32x32xf32, #tpu.memory_space<vmem>>, vector<1x32x32xf32>
    %7 = vector.shape_cast %6 : vector<1x32x32xf32> to vector<32x32xf32>
    %cst = arith.constant dense<0.000000e+00> : vector<8x32xf32>
    %8 = tpu.matmul %3, %7, %cst {dimension_numbers = #tpu.dot_dimension_numbers<[1], [0], [0], [1], [0, 0, 1, 1], [], []>} : vector<8x32xf32>, vector<32x32xf32>, vector<8x32xf32> -> vector<8x32xf32>
    %c0_8 = arith.constant 0 : index
    %c0_9 = arith.constant 0 : index
    %c0_10 = arith.constant 0 : index
    %9 = vector.load %arg8[%c0_8, %c0_9, %c0_10] : memref<1x1x32xf32, #tpu.memory_space<vmem>>, vector<1x1x32xf32>
    %10 = vector.shape_cast %9 : vector<1x1x32xf32> to vector<1x32xf32>
    %11 = vector.broadcast %10 : vector<1x32xf32> to vector<8x32xf32>
    %12 = arith.addf %8, %11 : vector<8x32xf32>
    %c0_11 = arith.constant 0 : index
    %c0_12 = arith.constant 0 : index
    %c0_13 = arith.constant 0 : index
    %13 = vector.load %arg9[%c0_11, %c0_12, %c0_13] : memref<1x32x64xf32, #tpu.memory_space<vmem>>, vector<1x32x64xf32>
    %14 = vector.shape_cast %13 : vector<1x32x64xf32> to vector<32x64xf32>
    %cst_14 = arith.constant dense<0.000000e+00> : vector<16x64xf32>
    %15 = tpu.matmul %5, %14, %cst_14 {dimension_numbers = #tpu.dot_dimension_numbers<[1], [0], [0], [1], [0, 0, 1, 1], [], []>} : vector<16x32xf32>, vector<32x64xf32>, vector<16x64xf32> -> vector<16x64xf32>
    %c0_15 = arith.constant 0 : index
    %c0_16 = arith.constant 0 : index
    %c0_17 = arith.constant 0 : index
    %16 = vector.load %arg10[%c0_15, %c0_16, %c0_17] : memref<1x1x64xf32, #tpu.memory_space<vmem>>, vector<1x1x64xf32>
    %17 = vector.shape_cast %16 : vector<1x1x64xf32> to vector<1x64xf32>
    %18 = vector.broadcast %17 : vector<1x64xf32> to vector<16x64xf32>
    %19 = arith.addf %15, %18 : vector<16x64xf32>
    %20 = vector.extract_strided_slice %19 {offsets = [0, 0], sizes = [16, 32], strides = [1, 1]} : vector<16x64xf32> to vector<16x32xf32>
    %21 = vector.extract_strided_slice %19 {offsets = [0, 32], sizes = [16, 32], strides = [1, 1]} : vector<16x64xf32> to vector<16x32xf32>
    %c0_18 = arith.constant 0 : index
    %c0_19 = arith.constant 0 : index
    %c0_20 = arith.constant 0 : index
    %c0_21 = arith.constant 0 : index
    %22 = vector.load %arg4[%c0_18, %c0_19, %c0_20, %c0_21] : memref<1x1x8x16xf32, #tpu.memory_space<vmem>>, vector<1x1x8x16xf32>
    %23 = vector.shape_cast %22 : vector<1x1x8x16xf32> to vector<8x16xf32>
    %24 = vector.extract_strided_slice %12 {offsets = [0, 0], sizes = [8, 8], strides = [1, 1]} : vector<8x32xf32> to vector<8x8xf32>
    %25 = vector.extract_strided_slice %20 {offsets = [0, 0], sizes = [16, 8], strides = [1, 1]} : vector<16x32xf32> to vector<16x8xf32>
    %26 = vector.extract_strided_slice %21 {offsets = [0, 0], sizes = [16, 8], strides = [1, 1]} : vector<16x32xf32> to vector<16x8xf32>
    %cst_22 = arith.constant dense<0.000000e+00> : vector<8x16xf32>
    %27 = tpu.matmul %24, %25, %cst_22 {dimension_numbers = #tpu.dot_dimension_numbers<[1], [1], [0], [0], [0, 0, 1, 0], [], []>} : vector<8x8xf32>, vector<16x8xf32>, vector<8x16xf32> -> vector<8x16xf32>
    %28 = arith.addf %27, %23 : vector<8x16xf32>
    %cst_23 = arith.constant dense<0xFF800000> : vector<8xf32>
    %29 = vector.multi_reduction <maximumf>, %28, %cst_23 [1] : vector<8x16xf32> to vector<8xf32>
    %30 = vector.shape_cast %29 : vector<8xf32> to vector<8x1xf32>
    %31 = vector.broadcast %30 : vector<8x1xf32> to vector<8x16xf32>
    %32 = arith.subf %28, %31 : vector<8x16xf32>
    %33 = math.exp %32 : vector<8x16xf32>
    %cst_24 = arith.constant dense<0.000000e+00> : vector<8xf32>
    %34 = vector.multi_reduction <add>, %33, %cst_24 [1] : vector<8x16xf32> to vector<8xf32>
    %35 = vector.shape_cast %34 : vector<8xf32> to vector<8x1xf32>
    %36 = vector.broadcast %35 : vector<8x1xf32> to vector<8x16xf32>
    %37 = arith.divf %33, %36 : vector<8x16xf32>
    %c0_25 = arith.constant 0 : index
    %c0_26 = arith.constant 0 : index
    %c0_27 = arith.constant 0 : index
    %c0_28 = arith.constant 0 : index
    %38 = vector.load %arg14[%c0_25, %c0_26, %c0_27, %c0_28] : memref<1x4x8x16xf32, #tpu.memory_space<vmem>>, vector<1x1x8x16xf32>
    %39 = vector.shape_cast %38 : vector<1x1x8x16xf32> to vector<8x16xf32>
    %40 = vector.shape_cast %37 : vector<8x16xf32> to vector<1x1x8x16xf32>
    tpu.vector_store %arg14[%c0_25, %c0_26, %c0_27, %c0_28], %40 {strides = array<i32>} : memref<1x4x8x16xf32, #tpu.memory_space<vmem>>, vector<1x1x8x16xf32>,
    %cst_29 = arith.constant dense<0.000000e+00> : vector<8x8xf32>
    %41 = tpu.matmul %37, %26, %cst_29 {dimension_numbers = #tpu.dot_dimension_numbers<[1], [0], [0], [1], [0, 0, 1, 1], [], []>} : vector<8x16xf32>, vector<16x8xf32>, vector<8x8xf32> -> vector<8x8xf32>
    %42 = vector.extract_strided_slice %12 {offsets = [0, 8], sizes = [8, 8], strides = [1, 1]} : vector<8x32xf32> to vector<8x8xf32>
    %43 = vector.extract_strided_slice %20 {offsets = [0, 8], sizes = [16, 8], strides = [1, 1]} : vector<16x32xf32> to vector<16x8xf32>
    %44 = vector.extract_strided_slice %21 {offsets = [0, 8], sizes = [16, 8], strides = [1, 1]} : vector<16x32xf32> to vector<16x8xf32>
    %cst_30 = arith.constant dense<0.000000e+00> : vector<8x16xf32>
    %45 = tpu.matmul %42, %43, %cst_30 {dimension_numbers = #tpu.dot_dimension_numbers<[1], [1], [0], [0], [0, 0, 1, 0], [], []>} : vector<8x8xf32>, vector<16x8xf32>, vector<8x16xf32> -> vector<8x16xf32>
    %46 = arith.addf %45, %23 : vector<8x16xf32>
    %cst_31 = arith.constant dense<0xFF800000> : vector<8xf32>
    %47 = vector.multi_reduction <maximumf>, %46, %cst_31 [1] : vector<8x16xf32> to vector<8xf32>
    %48 = vector.shape_cast %47 : vector<8xf32> to vector<8x1xf32>
    %49 = vector.broadcast %48 : vector<8x1xf32> to vector<8x16xf32>
    %50 = arith.subf %46, %49 : vector<8x16xf32>
    %51 = math.exp %50 : vector<8x16xf32>
    %cst_32 = arith.constant dense<0.000000e+00> : vector<8xf32>
    %52 = vector.multi_reduction <add>, %51, %cst_32 [1] : vector<8x16xf32> to vector<8xf32>
    %53 = vector.shape_cast %52 : vector<8xf32> to vector<8x1xf32>
    %54 = vector.broadcast %53 : vector<8x1xf32> to vector<8x16xf32>
    %55 = arith.divf %51, %54 : vector<8x16xf32>
    %c0_33 = arith.constant 0 : index
    %c1 = arith.constant 1 : index
    %c0_34 = arith.constant 0 : index
    %c0_35 = arith.constant 0 : index
    %56 = vector.load %arg14[%c0_33, %c1, %c0_34, %c0_35] : memref<1x4x8x16xf32, #tpu.memory_space<vmem>>, vector<1x1x8x16xf32>
    %57 = vector.shape_cast %56 : vector<1x1x8x16xf32> to vector<8x16xf32>
    %58 = vector.shape_cast %55 : vector<8x16xf32> to vector<1x1x8x16xf32>
    tpu.vector_store %arg14[%c0_33, %c1, %c0_34, %c0_35], %58 {strides = array<i32>} : memref<1x4x8x16xf32, #tpu.memory_space<vmem>>, vector<1x1x8x16xf32>,
    %cst_36 = arith.constant dense<0.000000e+00> : vector<8x8xf32>
    %59 = tpu.matmul %55, %44, %cst_36 {dimension_numbers = #tpu.dot_dimension_numbers<[1], [0], [0], [1], [0, 0, 1, 1], [], []>} : vector<8x16xf32>, vector<16x8xf32>, vector<8x8xf32> -> vector<8x8xf32>
    %60 = vector.extract_strided_slice %12 {offsets = [0, 16], sizes = [8, 8], strides = [1, 1]} : vector<8x32xf32> to vector<8x8xf32>
    %61 = vector.extract_strided_slice %20 {offsets = [0, 16], sizes = [16, 8], strides = [1, 1]} : vector<16x32xf32> to vector<16x8xf32>
    %62 = vector.extract_strided_slice %21 {offsets = [0, 16], sizes = [16, 8], strides = [1, 1]} : vector<16x32xf32> to vector<16x8xf32>
    %cst_37 = arith.constant dense<0.000000e+00> : vector<8x16xf32>
    %63 = tpu.matmul %60, %61, %cst_37 {dimension_numbers = #tpu.dot_dimension_numbers<[1], [1], [0], [0], [0, 0, 1, 0], [], []>} : vector<8x8xf32>, vector<16x8xf32>, vector<8x16xf32> -> vector<8x16xf32>
    %64 = arith.addf %63, %23 : vector<8x16xf32>
    %cst_38 = arith.constant dense<0xFF800000> : vector<8xf32>
    %65 = vector.multi_reduction <maximumf>, %64, %cst_38 [1] : vector<8x16xf32> to vector<8xf32>
    %66 = vector.shape_cast %65 : vector<8xf32> to vector<8x1xf32>
    %67 = vector.broadcast %66 : vector<8x1xf32> to vector<8x16xf32>
    %68 = arith.subf %64, %67 : vector<8x16xf32>
    %69 = math.exp %68 : vector<8x16xf32>
    %cst_39 = arith.constant dense<0.000000e+00> : vector<8xf32>
    %70 = vector.multi_reduction <add>, %69, %cst_39 [1] : vector<8x16xf32> to vector<8xf32>
    %71 = vector.shape_cast %70 : vector<8xf32> to vector<8x1xf32>
    %72 = vector.broadcast %71 : vector<8x1xf32> to vector<8x16xf32>
    %73 = arith.divf %69, %72 : vector<8x16xf32>
    %c0_40 = arith.constant 0 : index
    %c2 = arith.constant 2 : index
    %c0_41 = arith.constant 0 : index
    %c0_42 = arith.constant 0 : index
    %74 = vector.load %arg14[%c0_40, %c2, %c0_41, %c0_42] : memref<1x4x8x16xf32, #tpu.memory_space<vmem>>, vector<1x1x8x16xf32>
    %75 = vector.shape_cast %74 : vector<1x1x8x16xf32> to vector<8x16xf32>
    %76 = vector.shape_cast %73 : vector<8x16xf32> to vector<1x1x8x16xf32>
    tpu.vector_store %arg14[%c0_40, %c2, %c0_41, %c0_42], %76 {strides = array<i32>} : memref<1x4x8x16xf32, #tpu.memory_space<vmem>>, vector<1x1x8x16xf32>,
    %cst_43 = arith.constant dense<0.000000e+00> : vector<8x8xf32>
    %77 = tpu.matmul %73, %62, %cst_43 {dimension_numbers = #tpu.dot_dimension_numbers<[1], [0], [0], [1], [0, 0, 1, 1], [], []>} : vector<8x16xf32>, vector<16x8xf32>, vector<8x8xf32> -> vector<8x8xf32>
    %78 = vector.extract_strided_slice %12 {offsets = [0, 24], sizes = [8, 8], strides = [1, 1]} : vector<8x32xf32> to vector<8x8xf32>
    %79 = vector.extract_strided_slice %20 {offsets = [0, 24], sizes = [16, 8], strides = [1, 1]} : vector<16x32xf32> to vector<16x8xf32>
    %80 = vector.extract_strided_slice %21 {offsets = [0, 24], sizes = [16, 8], strides = [1, 1]} : vector<16x32xf32> to vector<16x8xf32>
    %cst_44 = arith.constant dense<0.000000e+00> : vector<8x16xf32>
    %81 = tpu.matmul %78, %79, %cst_44 {dimension_numbers = #tpu.dot_dimension_numbers<[1], [1], [0], [0], [0, 0, 1, 0], [], []>} : vector<8x8xf32>, vector<16x8xf32>, vector<8x16xf32> -> vector<8x16xf32>
    %82 = arith.addf %81, %23 : vector<8x16xf32>
    %cst_45 = arith.constant dense<0xFF800000> : vector<8xf32>
    %83 = vector.multi_reduction <maximumf>, %82, %cst_45 [1] : vector<8x16xf32> to vector<8xf32>
    %84 = vector.shape_cast %83 : vector<8xf32> to vector<8x1xf32>
    %85 = vector.broadcast %84 : vector<8x1xf32> to vector<8x16xf32>
    %86 = arith.subf %82, %85 : vector<8x16xf32>
    %87 = math.exp %86 : vector<8x16xf32>
    %cst_46 = arith.constant dense<0.000000e+00> : vector<8xf32>
    %88 = vector.multi_reduction <add>, %87, %cst_46 [1] : vector<8x16xf32> to vector<8xf32>
    %89 = vector.shape_cast %88 : vector<8xf32> to vector<8x1xf32>
    %90 = vector.broadcast %89 : vector<8x1xf32> to vector<8x16xf32>
    %91 = arith.divf %87, %90 : vector<8x16xf32>
    %c0_47 = arith.constant 0 : index
    %c3 = arith.constant 3 : index
    %c0_48 = arith.constant 0 : index
    %c0_49 = arith.constant 0 : index
    %92 = vector.load %arg14[%c0_47, %c3, %c0_48, %c0_49] : memref<1x4x8x16xf32, #tpu.memory_space<vmem>>, vector<1x1x8x16xf32>
    %93 = vector.shape_cast %92 : vector<1x1x8x16xf32> to vector<8x16xf32>
    %94 = vector.shape_cast %91 : vector<8x16xf32> to vector<1x1x8x16xf32>
    tpu.vector_store %arg14[%c0_47, %c3, %c0_48, %c0_49], %94 {strides = array<i32>} : memref<1x4x8x16xf32, #tpu.memory_space<vmem>>, vector<1x1x8x16xf32>,
    %cst_50 = arith.constant dense<0.000000e+00> : vector<8x8xf32>
    %95 = tpu.matmul %91, %80, %cst_50 {dimension_numbers = #tpu.dot_dimension_numbers<[1], [0], [0], [1], [0, 0, 1, 1], [], []>} : vector<8x16xf32>, vector<16x8xf32>, vector<8x8xf32> -> vector<8x8xf32>
    %96 = tpu.concatenate %41, %59, %77, %95 in 1 : vector<8x8xf32>, vector<8x8xf32>, vector<8x8xf32>, vector<8x8xf32> -> vector<8x32xf32>
    %c0_51 = arith.constant 0 : index
    %c0_52 = arith.constant 0 : index
    %97 = vector.load %arg16[%c0_51, %c0_52] : memref<8x32xf32, #tpu.memory_space<vmem>>, vector<8x32xf32>
    %c0_53 = arith.constant 0 : index
    %c0_54 = arith.constant 0 : index
    %c0_55 = arith.constant 0 : index
    %98 = vector.load %arg11[%c0_53, %c0_54, %c0_55] : memref<1x32x32xf32, #tpu.memory_space<vmem>>, vector<1x32x32xf32>
    %99 = vector.shape_cast %98 : vector<1x32x32xf32> to vector<32x32xf32>
    %cst_56 = arith.constant dense<0.000000e+00> : vector<8x32xf32>
    %100 = tpu.matmul %96, %99, %cst_56 {dimension_numbers = #tpu.dot_dimension_numbers<[1], [0], [0], [1], [0, 0, 1, 1], [], []>} : vector<8x32xf32>, vector<32x32xf32>, vector<8x32xf32> -> vector<8x32xf32>
    %101 = arith.addf %97, %100 : vector<8x32xf32>
    %c0_57 = arith.constant 0 : index
    %c0_58 = arith.constant 0 : index
    %102 = vector.load %arg16[%c0_57, %c0_58] : memref<8x32xf32, #tpu.memory_space<vmem>>, vector<8x32xf32>
    tpu.vector_store %arg16[%c0_57, %c0_58], %101 {strides = array<i32>} : memref<8x32xf32, #tpu.memory_space<vmem>>, vector<8x32xf32>,
    %c0_i32_59 = arith.constant 0 : i32
    %103 = arith.cmpi eq, %arg1, %c0_i32_59 : i32
    %104 = arith.extui %103 : i1 to i32
    %c0_i32_60 = arith.constant 0 : i32
    %105 = arith.cmpi ne, %104, %c0_i32_60 : i32
    scf.if %105 {
      %c0_61 = arith.constant 0 : index
      %c0_62 = arith.constant 0 : index
      %106 = vector.load %arg16[%c0_61, %c0_62] : memref<8x32xf32, #tpu.memory_space<vmem>>, vector<8x32xf32>
      %c0_63 = arith.constant 0 : index
      %c0_64 = arith.constant 0 : index
      %107 = vector.load %arg12[%c0_63, %c0_64] : memref<1x32xf32, #tpu.memory_space<vmem>>, vector<1x32xf32>
      %108 = vector.broadcast %107 : vector<1x32xf32> to vector<8x32xf32>
      %109 = arith.addf %106, %108 : vector<8x32xf32>
      %c0_65 = arith.constant 0 : index
      %c0_66 = arith.constant 0 : index
      %c0_67 = arith.constant 0 : index
      %110 = vector.load %arg2[%c0_65, %c0_66, %c0_67] : memref<1x8x32xf32, #tpu.memory_space<vmem>>, vector<1x8x32xf32>
      %111 = vector.shape_cast %110 : vector<1x8x32xf32> to vector<8x32xf32>
      %112 = arith.addf %109, %111 : vector<8x32xf32>
      %c0_68 = arith.constant 0 : index
      %c0_69 = arith.constant 0 : index
      %c0_70 = arith.constant 0 : index
      %113 = vector.load %arg13[%c0_68, %c0_69, %c0_70] : memref<1x8x32xf32, #tpu.memory_space<vmem>>, vector<1x8x32xf32>
      %114 = vector.shape_cast %113 : vector<1x8x32xf32> to vector<8x32xf32>
      %115 = vector.shape_cast %112 : vector<8x32xf32> to vector<1x8x32xf32>
      tpu.vector_store %arg13[%c0_68, %c0_69, %c0_70], %115 {strides = array<i32>} : memref<1x8x32xf32, #tpu.memory_space<vmem>>, vector<1x8x32xf32>,
    } else {
    }
    return
  }
  func.func @transform_0(%arg0: i32, %arg1: i32) -> (i32, i32, i32) {
    %c0_i32 = arith.constant 0 : i32
    %c0_i32_0 = arith.constant 0 : i32
    %c0_i32_1 = arith.constant 0 : i32
    return %arg0, %c0_i32, %c0_i32_0 : i32, i32, i32
  }
  func.func @transform_1(%arg0: i32, %arg1: i32) -> (i32, i32, i32) {
    %c0_i32 = arith.constant 0 : i32
    %c0_i32_0 = arith.constant 0 : i32
    %c0_i32_1 = arith.constant 0 : i32
    return %arg0, %c0_i32, %c0_i32_0 : i32, i32, i32
  }
  func.func @transform_2(%arg0: i32, %arg1: i32) -> (i32, i32, i32, i32) {
    %c0_i32 = arith.constant 0 : i32
    %c0_i32_0 = arith.constant 0 : i32
    %c0_i32_1 = arith.constant 0 : i32
    %c0_i32_2 = arith.constant 0 : i32
    return %arg0, %c0_i32, %c0_i32_0, %c0_i32_1 : i32, i32, i32, i32
  }
  func.func @transform_3(%arg0: i32, %arg1: i32) -> (i32, i32) {
    %c0_i32 = arith.constant 0 : i32
    %c0_i32_0 = arith.constant 0 : i32
    %c0_i32_1 = arith.constant 0 : i32
    return %c0_i32, %c0_i32_0 : i32, i32
  }
  func.func @transform_4(%arg0: i32, %arg1: i32) -> (i32, i32) {
    %c0_i32 = arith.constant 0 : i32
    %c0_i32_0 = arith.constant 0 : i32
    %c0_i32_1 = arith.constant 0 : i32
    return %c0_i32, %c0_i32_0 : i32, i32
  }
  func.func @transform_5(%arg0: i32, %arg1: i32) -> (i32, i32, i32) {
    %c0_i32 = arith.constant 0 : i32
    %c0_i32_0 = arith.constant 0 : i32
    %c0_i32_1 = arith.constant 0 : i32
    return %arg1, %c0_i32, %c0_i32_0 : i32, i32, i32
  }
  func.func @transform_6(%arg0: i32, %arg1: i32) -> (i32, i32, i32) {
    %c0_i32 = arith.constant 0 : i32
    %c0_i32_0 = arith.constant 0 : i32
    %c0_i32_1 = arith.constant 0 : i32
    return %arg1, %c0_i32, %c0_i32_0 : i32, i32, i32
  }
  func.func @transform_7(%arg0: i32, %arg1: i32) -> (i32, i32, i32) {
    %c0_i32 = arith.constant 0 : i32
    %c0_i32_0 = arith.constant 0 : i32
    %c0_i32_1 = arith.constant 0 : i32
    return %arg1, %c0_i32, %c0_i32_0 : i32, i32, i32
  }
  func.func @transform_8(%arg0: i32, %arg1: i32) -> (i32, i32, i32) {
    %c0_i32 = arith.constant 0 : i32
    %c0_i32_0 = arith.constant 0 : i32
    %c0_i32_1 = arith.constant 0 : i32
    return %arg1, %c0_i32, %c0_i32_0 : i32, i32, i32
  }
  func.func @transform_9(%arg0: i32, %arg1: i32) -> (i32, i32, i32) {
    %c0_i32 = arith.constant 0 : i32
    %c0_i32_0 = arith.constant 0 : i32
    %c0_i32_1 = arith.constant 0 : i32
    return %arg1, %c0_i32, %c0_i32_0 : i32, i32, i32
  }
  func.func @transform_10(%arg0: i32, %arg1: i32) -> (i32, i32) {
    %c0_i32 = arith.constant 0 : i32
    %c0_i32_0 = arith.constant 0 : i32
    %c0_i32_1 = arith.constant 0 : i32
    return %c0_i32, %c0_i32_0 : i32, i32
  }
  func.func @transform_11(%arg0: i32, %arg1: i32) -> (i32, i32, i32) {
    %c0_i32 = arith.constant 0 : i32
    %c0_i32_0 = arith.constant 0 : i32
    %c0_i32_1 = arith.constant 0 : i32
    return %arg0, %c0_i32, %c0_i32_0 : i32, i32, i32
  }
  func.func @transform_12(%arg0: i32, %arg1: i32) -> (i32, i32, i32, i32) {
    %c0_i32 = arith.constant 0 : i32
    %c0_i32_0 = arith.constant 0 : i32
    %c0_i32_1 = arith.constant 0 : i32
    return %arg0, %arg1, %c0_i32, %c0_i32_0 : i32, i32, i32, i32
  }
}

module attributes {stable_mosaic.version = 11 : i64} {
  func.func @_ffn_kernel(%arg0: i32, %arg1: i32, %arg2: memref<16x32xf32, #tpu.memory_space<vmem>>, %arg3: memref<1x32xf32, #tpu.memory_space<vmem>>, %arg4: memref<1x32xf32, #tpu.memory_space<vmem>>, %arg5: memref<32x64xf32, #tpu.memory_space<vmem>>, %arg6: memref<1x64xf32, #tpu.memory_space<vmem>>, %arg7: memref<64x32xf32, #tpu.memory_space<vmem>>, %arg8: memref<1x32xf32, #tpu.memory_space<vmem>>, %arg9: memref<16x32xf32, #tpu.memory_space<vmem>>, %arg10: memref<16x32xf32, #tpu.memory_space<vmem>>, %arg11: memref<16x32xf32, #tpu.memory_space<vmem>>) attributes {dimension_semantics = [#tpu.dimension_semantics<parallel>, #tpu.dimension_semantics<arbitrary>], iteration_bounds = array<i64: 1, 1>, scalar_prefetch = 0 : i64, scratch_operands = 2 : i64, tpu.core_type = #tpu.core_type<tc>, window_params = [{transform_indices = @transform_0, window_bounds = array<i64: 16, 32>}, {pipeline_mode = #tpu.pipeline_mode<synchronous>, transform_indices = @transform_1, window_bounds = array<i64: 1, 32>}, {pipeline_mode = #tpu.pipeline_mode<synchronous>, transform_indices = @transform_2, window_bounds = array<i64: 1, 32>}, {transform_indices = @transform_3, window_bounds = array<i64: 32, 64>}, {transform_indices = @transform_4, window_bounds = array<i64: 1, 64>}, {transform_indices = @transform_5, window_bounds = array<i64: 64, 32>}, {pipeline_mode = #tpu.pipeline_mode<synchronous>, transform_indices = @transform_6, window_bounds = array<i64: 1, 32>}, {transform_indices = @transform_7, window_bounds = array<i64: 16, 32>}]} {
    %c0_i32 = arith.constant 0 : i32
    %0 = arith.cmpi eq, %arg1, %c0_i32 : i32
    %1 = arith.extui %0 : i1 to i32
    %c0_i32_0 = arith.constant 0 : i32
    %2 = arith.cmpi ne, %1, %c0_i32_0 : i32
    scf.if %2 {
      %c0_16 = arith.constant 0 : index
      %c0_17 = arith.constant 0 : index
      %19 = vector.load %arg2[%c0_16, %c0_17] : memref<16x32xf32, #tpu.memory_space<vmem>>, vector<16x32xf32>
      %c0_18 = arith.constant 0 : index
      %c0_19 = arith.constant 0 : index
      %20 = vector.load %arg3[%c0_18, %c0_19] : memref<1x32xf32, #tpu.memory_space<vmem>>, vector<1x32xf32>
      %c0_20 = arith.constant 0 : index
      %c0_21 = arith.constant 0 : index
      %21 = vector.load %arg4[%c0_20, %c0_21] : memref<1x32xf32, #tpu.memory_space<vmem>>, vector<1x32xf32>
      %cst_22 = arith.constant dense<0.000000e+00> : vector<16xf32>
      %22 = vector.multi_reduction <add>, %19, %cst_22 [1] : vector<16x32xf32> to vector<16xf32>
      %23 = vector.shape_cast %22 : vector<16xf32> to vector<16x1xf32>
      %cst_23 = arith.constant 3.200000e+01 : f32
      %24 = vector.broadcast %cst_23 : f32 to vector<16x1xf32>
      %25 = arith.divf %23, %24 : vector<16x1xf32>
      %26 = vector.broadcast %25 : vector<16x1xf32> to vector<16x32xf32>
      %27 = arith.subf %19, %26 : vector<16x32xf32>
      %28 = arith.mulf %27, %27 : vector<16x32xf32>
      %cst_24 = arith.constant dense<0.000000e+00> : vector<16xf32>
      %29 = vector.multi_reduction <add>, %28, %cst_24 [1] : vector<16x32xf32> to vector<16xf32>
      %30 = vector.shape_cast %29 : vector<16xf32> to vector<16x1xf32>
      %cst_25 = arith.constant 3.200000e+01 : f32
      %31 = vector.broadcast %cst_25 : f32 to vector<16x1xf32>
      %32 = arith.divf %30, %31 : vector<16x1xf32>
      %33 = vector.broadcast %25 : vector<16x1xf32> to vector<16x32xf32>
      %34 = arith.subf %19, %33 : vector<16x32xf32>
      %cst_26 = arith.constant 9.99999974E-6 : f32
      %35 = vector.broadcast %cst_26 : f32 to vector<16x1xf32>
      %36 = arith.addf %32, %35 : vector<16x1xf32>
      %37 = math.rsqrt %36 : vector<16x1xf32>
      %38 = vector.broadcast %37 : vector<16x1xf32> to vector<16x32xf32>
      %39 = arith.mulf %34, %38 : vector<16x32xf32>
      %40 = vector.broadcast %20 : vector<1x32xf32> to vector<16x32xf32>
      %41 = arith.mulf %39, %40 : vector<16x32xf32>
      %42 = vector.broadcast %21 : vector<1x32xf32> to vector<16x32xf32>
      %43 = arith.addf %41, %42 : vector<16x32xf32>
      %c0_27 = arith.constant 0 : index
      %c0_28 = arith.constant 0 : index
      %44 = vector.load %arg10[%c0_27, %c0_28] : memref<16x32xf32, #tpu.memory_space<vmem>>, vector<16x32xf32>
      tpu.vector_store %arg10[%c0_27, %c0_28], %43 {strides = array<i32>} : memref<16x32xf32, #tpu.memory_space<vmem>>, vector<16x32xf32>,
      %cst_29 = arith.constant 0.000000e+00 : f32
      %45 = vector.broadcast %cst_29 : f32 to vector<16x32xf32>
      %c0_30 = arith.constant 0 : index
      %c0_31 = arith.constant 0 : index
      %46 = vector.load %arg11[%c0_30, %c0_31] : memref<16x32xf32, #tpu.memory_space<vmem>>, vector<16x32xf32>
      tpu.vector_store %arg11[%c0_30, %c0_31], %45 {strides = array<i32>} : memref<16x32xf32, #tpu.memory_space<vmem>>, vector<16x32xf32>,
    } else {
    }
    %c0 = arith.constant 0 : index
    %c0_1 = arith.constant 0 : index
    %3 = vector.load %arg10[%c0, %c0_1] : memref<16x32xf32, #tpu.memory_space<vmem>>, vector<16x32xf32>
    %c0_2 = arith.constant 0 : index
    %c0_3 = arith.constant 0 : index
    %4 = vector.load %arg5[%c0_2, %c0_3] : memref<32x64xf32, #tpu.memory_space<vmem>>, vector<32x64xf32>
    %cst = arith.constant dense<0.000000e+00> : vector<16x64xf32>
    %5 = tpu.matmul %3, %4, %cst {dimension_numbers = #tpu.dot_dimension_numbers<[1], [0], [0], [1], [0, 0, 1, 1], [], []>} : vector<16x32xf32>, vector<32x64xf32>, vector<16x64xf32> -> vector<16x64xf32>
    %c0_4 = arith.constant 0 : index
    %c0_5 = arith.constant 0 : index
    %6 = vector.load %arg6[%c0_4, %c0_5] : memref<1x64xf32, #tpu.memory_space<vmem>>, vector<1x64xf32>
    %7 = vector.broadcast %6 : vector<1x64xf32> to vector<16x64xf32>
    %8 = arith.addf %5, %7 : vector<16x64xf32>
    %cst_6 = arith.constant 0.000000e+00 : f32
    %9 = vector.broadcast %cst_6 : f32 to vector<16x64xf32>
    %10 = arith.maximumf %8, %9 : vector<16x64xf32>
    %c0_7 = arith.constant 0 : index
    %c0_8 = arith.constant 0 : index
    %11 = vector.load %arg11[%c0_7, %c0_8] : memref<16x32xf32, #tpu.memory_space<vmem>>, vector<16x32xf32>
    %c0_9 = arith.constant 0 : index
    %c0_10 = arith.constant 0 : index
    %12 = vector.load %arg7[%c0_9, %c0_10] : memref<64x32xf32, #tpu.memory_space<vmem>>, vector<64x32xf32>
    %cst_11 = arith.constant dense<0.000000e+00> : vector<16x32xf32>
    %13 = tpu.matmul %10, %12, %cst_11 {dimension_numbers = #tpu.dot_dimension_numbers<[1], [0], [0], [1], [0, 0, 1, 1], [], []>} : vector<16x64xf32>, vector<64x32xf32>, vector<16x32xf32> -> vector<16x32xf32>
    %14 = arith.addf %11, %13 : vector<16x32xf32>
    %c0_12 = arith.constant 0 : index
    %c0_13 = arith.constant 0 : index
    %15 = vector.load %arg11[%c0_12, %c0_13] : memref<16x32xf32, #tpu.memory_space<vmem>>, vector<16x32xf32>
    tpu.vector_store %arg11[%c0_12, %c0_13], %14 {strides = array<i32>} : memref<16x32xf32, #tpu.memory_space<vmem>>, vector<16x32xf32>,
    %c0_i32_14 = arith.constant 0 : i32
    %16 = arith.cmpi eq, %arg1, %c0_i32_14 : i32
    %17 = arith.extui %16 : i1 to i32
    %c0_i32_15 = arith.constant 0 : i32
    %18 = arith.cmpi ne, %17, %c0_i32_15 : i32
    scf.if %18 {
      %c0_16 = arith.constant 0 : index
      %c0_17 = arith.constant 0 : index
      %19 = vector.load %arg11[%c0_16, %c0_17] : memref<16x32xf32, #tpu.memory_space<vmem>>, vector<16x32xf32>
      %c0_18 = arith.constant 0 : index
      %c0_19 = arith.constant 0 : index
      %20 = vector.load %arg8[%c0_18, %c0_19] : memref<1x32xf32, #tpu.memory_space<vmem>>, vector<1x32xf32>
      %21 = vector.broadcast %20 : vector<1x32xf32> to vector<16x32xf32>
      %22 = arith.addf %19, %21 : vector<16x32xf32>
      %c0_20 = arith.constant 0 : index
      %c0_21 = arith.constant 0 : index
      %23 = vector.load %arg2[%c0_20, %c0_21] : memref<16x32xf32, #tpu.memory_space<vmem>>, vector<16x32xf32>
      %24 = arith.addf %22, %23 : vector<16x32xf32>
      %c0_22 = arith.constant 0 : index
      %c0_23 = arith.constant 0 : index
      %25 = vector.load %arg9[%c0_22, %c0_23] : memref<16x32xf32, #tpu.memory_space<vmem>>, vector<16x32xf32>
      tpu.vector_store %arg9[%c0_22, %c0_23], %24 {strides = array<i32>} : memref<16x32xf32, #tpu.memory_space<vmem>>, vector<16x32xf32>,
    } else {
    }
    return
  }
  func.func @transform_0(%arg0: i32, %arg1: i32) -> (i32, i32) {
    %c0_i32 = arith.constant 0 : i32
    %c0_i32_0 = arith.constant 0 : i32
    return %arg0, %c0_i32 : i32, i32
  }
  func.func @transform_1(%arg0: i32, %arg1: i32) -> (i32, i32) {
    %c0_i32 = arith.constant 0 : i32
    %c0_i32_0 = arith.constant 0 : i32
    %c0_i32_1 = arith.constant 0 : i32
    return %c0_i32, %c0_i32_0 : i32, i32
  }
  func.func @transform_2(%arg0: i32, %arg1: i32) -> (i32, i32) {
    %c0_i32 = arith.constant 0 : i32
    %c0_i32_0 = arith.constant 0 : i32
    %c0_i32_1 = arith.constant 0 : i32
    return %c0_i32, %c0_i32_0 : i32, i32
  }
  func.func @transform_3(%arg0: i32, %arg1: i32) -> (i32, i32) {
    %c0_i32 = arith.constant 0 : i32
    %c0_i32_0 = arith.constant 0 : i32
    return %c0_i32, %arg1 : i32, i32
  }
  func.func @transform_4(%arg0: i32, %arg1: i32) -> (i32, i32) {
    %c0_i32 = arith.constant 0 : i32
    %c0_i32_0 = arith.constant 0 : i32
    return %c0_i32, %arg1 : i32, i32
  }
  func.func @transform_5(%arg0: i32, %arg1: i32) -> (i32, i32) {
    %c0_i32 = arith.constant 0 : i32
    %c0_i32_0 = arith.constant 0 : i32
    return %arg1, %c0_i32 : i32, i32
  }
  func.func @transform_6(%arg0: i32, %arg1: i32) -> (i32, i32) {
    %c0_i32 = arith.constant 0 : i32
    %c0_i32_0 = arith.constant 0 : i32
    %c0_i32_1 = arith.constant 0 : i32
    return %c0_i32, %c0_i32_0 : i32, i32
  }
  func.func @transform_7(%arg0: i32, %arg1: i32) -> (i32, i32) {
    %c0_i32 = arith.constant 0 : i32
    %c0_i32_0 = arith.constant 0 : i32
    return %arg0, %c0_i32 : i32, i32
  }
}

</mosaic_0001>

<bundles_post_ra>
// kernel: transformer_decoder_layer.5
= control target key start
LH: loop header
LB: loop body
LE: loop exit
PB: predicated region body
PF: predicated region fallthrough
CT: control target
= control target key end

     0   :  { %vm35_vm0 = vcmask 261120   ;;  %s521_s0 = inlined_call_operand.vmem [shape: f32[16,32], index: 0, kind: input, shape index: {}]   ;;  %s522_s1 = inlined_call_operand.vmem [shape: f32[1,32], index: 1, kind: input, shape index: {}]   ;;  %s523_s2 = inlined_call_operand.vmem [shape: f32[1,32], index: 2, kind: input, shape index: {}]   ;;  %s524_s3 = inlined_call_operand.vmem [shape: f32[32,64], index: 3, kind: input, shape index: {}]   ;;  %s525_s4 = inlined_call_operand.vmem [shape: f32[1,64], index: 4, kind: input, shape index: {}]   ;;  %s526_s5 = inlined_call_operand.vmem [shape: f32[64,32], index: 5, kind: input, shape index: {}]   ;;  %s527_s6 = inlined_call_operand.vmem [shape: f32[1,32], index: 6, kind: input, shape index: {}]   ;;  %s528_s7 = inlined_call_operand.hbm [shape: f32[16,32], index: 7, kind: output, shape index: {}]  }
   0x1   :  { %v443_v0 = vld [vmem:[%s521_s0] sm:$0xff]  ;;  %v448_v1 = vld [vmem:[%s521_s0 + $0x8] sm:$0xff] }
   0x2   :  { %12 = vsyncpa [#allocation5], 0  ;;  %v36_v2 = vsel %vm35_vm0, %v443_v0, 0.0  ;;  %v39_v3 = vsel %vm35_vm0, %v448_v1, 0.0  ;;  %v88_v14 = vld [vmem:[%s524_s3 + $0x18] sm:$0xff]  ;;  %v87_v15 = vld [vmem:[%s524_s3 + $0x10] sm:$0xff] }
   0x3   :  { %37 = vadd.xlane.f32.xlu0 %v36_v2  ;;  %336 = vmatprep.subr.mxu0 %v88_v14  ;;  %v86_v16 = vld [vmem:[%s524_s3 + $0x8] sm:$0xff]  ;;  %v85_v17 = vld [vmem:[%s524_s3] sm:$0xff]  ;;  %v189_v18 = vld [vmem:[%s526_s5 + $0x38] sm:$0xff]  ;;  %v396_v44 = vmov 0.0   ;;  %vm190_vm1 = vcmask 523264   ;;  %s397_s30 = smov [#allocation4]  }
   0x4   :  { %337 = vmatpush3.msra.mxu0 %v88_v14  ;;  %v188_v19 = vld [vmem:[%s526_s5 + $0x30] sm:$0xff]  ;;  %347 = vmatprep.subr.mxu1 %v189_v18  ;;  %v187_v20 = vld [vmem:[%s526_s5 + $0x28] sm:$0xff]  ;;  %v186_v21 = vld [vmem:[%s526_s5 + $0x20] sm:$0xff]  ;;  %82 = vst.msk [vmem:[#allocation3 + $0x8] sm:$0xff] %vm35_vm0, %v396_v44  ;;  %s301_s8 = sshll.u32 %s397_s30, 4  ;;  %s302_s8 = int_to_ptr.vmem [resolvable:$true] %s301_s8 }
   0x5   :  { %338 = vmatprep.subr.mxu0 %v87_v15  ;;  %348 = vmatpush3.msra.mxu1 %v189_v18  ;;  %v312_v29 = vld [vmem:[%s522_s1] ss:$0 sm:$0xff]  ;;  %v185_v40 = vld [vmem:[%s526_s5 + $0x18] sm:$0xff]  ;;  %v184_v41 = vld [vmem:[%s526_s5 + $0x10] sm:$0xff]  ;;  %81 = vst.msk [vmem:[#allocation3] sm:$0xff] %vm35_vm0, %v396_v44  ;;  %s374_s9 = scalar_lea.vmem %s302_s8, 256  ;;  %p379_p1 = scmp.lt.s32.totalorder %s302_s8, %s302_s8 }
   0x6   :  { %339 = vmatpush3.msra.mxu0 %v87_v15  ;;  %349 = vmatprep.subr.mxu1 %v188_v19  ;;  %v313_v31 = vld [vmem:[%s523_s2] ss:$0 sm:$0xff]  ;;  %v183_v42 = vld [vmem:[%s526_s5 + $0x8] sm:$0xff]  ;;  %p375_p0 = scmp.ne.s32.totalorder %s302_s8, %s374_s9  ;;  %p380_p2 = scmp.lt.s32.totalorder %s374_s9, %s374_s9 }
   0x7   :  { %40 = vadd.xlane.f32.xlu0 %v39_v3  ;;  %340 = vmatprep.subr.mxu0 %v86_v16  ;;  %v182_v43 = vld [vmem:[%s526_s5] sm:$0xff] }
   0x8   :  { %341 = vmatpush3.msra.mxu0 %v86_v16  ;;  %350 = vmatpush3.msra.mxu1 %v188_v19  ;;  %v314_v45 = vld [vmem:[%s525_s4] ss:$0 sm:$0xff]  ;;  %p381_p3 = por %p380_p2, %p379_p1 }
   0x9   :  { %342 = vmatprep.subr.mxu0 %v85_v17  ;;  %351 = vmatprep.subr.mxu1 %v187_v20  ;;  %v319_v58 = vld [vmem:[%s527_s6] ss:$0 sm:$0xff] }
   0xa   :  { %343 = vmatpush3.msra.mxu0 %v85_v17  ;;  %352 = vmatpush3.msra.mxu1 %v187_v20  ;;  %p382_p4 = pnand %p381_p3, %p375_p0 }
   0xb   :  { %353 = vmatprep.subr.mxu1 %v186_v21  ;;  %v181_v52 = vld [vmem:[#allocation3 + $0x8] sm:$0xff] }
   0xc   :  { %354 = vmatpush3.msra.mxu1 %v186_v21  ;;  %v180_v54 = vld [vmem:[#allocation3] sm:$0xff] }
   0xd   :  { %355 = vmatprep.subr.mxu1 %v185_v40 }
   0xe   :  { %356 = vmatpush3.msra.mxu1 %v185_v40 }
   0xf   :  { %357 = vmatprep.subr.mxu1 %v184_v41 }
  0x10   :  { %358 = vmatpush3.msra.mxu1 %v184_v41 }
  0x11   :  { %359 = vmatprep.subr.mxu1 %v183_v42 }
  0x12   :  { %360 = vmatpush3.msra.mxu1 %v183_v42 }
  0x13   :  { %361 = vmatprep.subr.mxu1 %v182_v43 }
  0x14   :  { %362 = vmatpush3.msra.mxu1 %v182_v43 }
  0x8c   :  { %v38_v4 = vpop.xlane.xlu0 %37 }
  0x8d   :  { %v43_v5 = vmul.f32 0.03125, %v38_v4 }
  0x8f   :  { %v45_v6 = vsub.f32 %v443_v0, %v43_v5 }
  0x90   :  { %v41_v7 = vpop.xlane.xlu0 %40 }
  0x91   :  { %v44_v8 = vmul.f32 0.03125, %v41_v7  ;;  %v47_v9 = vmul.f32 %v45_v6, %v45_v6 }
  0x93   :  { %v46_v10 = vsub.f32 %v448_v1, %v44_v8  ;;  %v49_v11 = vsel %vm35_vm0, %v47_v9, 0.0 }
  0x94   :  { %50 = vadd.xlane.f32.xlu1 %v49_v11 }
  0x95   :  { %v48_v12 = vmul.f32 %v46_v10, %v46_v10 }
  0x97   :  { %v52_v13 = vsel %vm35_vm0, %v48_v12, 0.0 }
  0x98   :  { %53 = vadd.xlane.f32.xlu1 %v52_v13 }
 0x11d   :  { %v51_v22 = vpop.xlane.xlu1 %50 }
 0x11e   :  { %v55_v23 = vmul.f32 0.03125, %v51_v22 }
 0x120   :  { %v57_v24 = vadd.f32 1e-05, %v55_v23 }
 0x121   :  { %v54_v25 = vpop.xlane.xlu1 %53 }
 0x122   :  { %370 = vrsqrt.f32 %v57_v24  ;;  %v56_v26 = vmul.f32 0.03125, %v54_v25 }
 0x124   :  { %v58_v27 = vadd.f32 1e-05, %v56_v26 }
 0x126   :  { %372 = vrsqrt.f32 %v58_v27 }
 0x12f   :  { %v371_v28 = vpop.eup %370 }
 0x130   :  { %v61_v30 = vmul.f32 %v371_v28, %v45_v6 }
 0x132   :  { %v69_v32 = vmul.f32 %v312_v29, %v61_v30 }
 0x133   :  { %v373_v33 = vpop.eup %372 }
 0x134   :  { %v77_v34 = vadd.f32 %v313_v31, %v69_v32  ;;  %v62_v35 = vmul.f32 %v373_v33, %v46_v10 }
 0x136   :  { %79 = vst.msk [vmem:[#allocation2] sm:$0xff] %vm35_vm0, %v77_v34  ;;  %v70_v36 = vmul.f32 %v312_v29, %v62_v35 }
 0x138   :  { %v78_v37 = vadd.f32 %v313_v31, %v70_v36 }
 0x13a   :  { %80 = vst.msk [vmem:[#allocation2 + $0x8] sm:$0xff] %vm35_vm0, %v78_v37 }
 0x13d   :  { %v83_v38 = vld [vmem:[#allocation2] sm:$0xff] }
 0x13e   :  { %344 = vmatprep.mubr.msk.f32.mxu0 %vm35_vm0, %v83_v38 }
 0x141   :  { %v84_v39 = vld [vmem:[#allocation2 + $0x8] sm:$0xff] }
 0x142   :  { %345 = vmatmul.mubr.msk.f32.vlgmr.msra.gmra.mxu0 %vm35_vm0, %v84_v39 }
 0x202   :  { %v346_v46 = vpop.f32.mrf.mxu0 }
 0x203   :  { %v175_v47 = vadd.f32 %v346_v46, %v314_v45 }
 0x204   :  { %v169_v48 = vpop.f32.mrf.mxu0 }
 0x205   :  { %v170_v49 = vadd.f32 %v314_v45, %v169_v48  ;;  %v179_v51 = vmax.f32 %v175_v47, 0.0 }
 0x207   :  { %v178_v50 = vmax.f32 %v170_v49, 0.0 }
 0x209   :  { %363 = vmatprep.mubr.msk.f32.mxu1 %vm190_vm1, %v178_v50 }
 0x20a   :  { %364 = vmatmul.mubr.msk.f32.vlgmr.msra.gmra.mxu1 %vm190_vm1, %v179_v51 }
 0x2ca   :  { %v365_v53 = vpop.f32.mrf.mxu1 }
 0x2cb   :  { %v273_v55 = vadd.f32 %v365_v53, %v181_v52 }
 0x2cc   :  { %v263_v56 = vpop.f32.mrf.mxu1 }
 0x2cd   :  { %275 = vst.msk [vmem:[#allocation3 + $0x8] sm:$0xff] %vm35_vm0, %v273_v55  ;;  %v272_v57 = vadd.f32 %v263_v56, %v180_v54 }
 0x2cf   :  { %274 = vst.msk [vmem:[#allocation3] sm:$0xff] %vm35_vm0, %v272_v57 }
 0x2d4   :  { %v280_v59 = vld [vmem:[#allocation3 + $0x8] sm:$0xff] }
 0x2d5   :  { %v289_v60 = vadd.f32 %v319_v58, %v280_v59 }
 0x2d6   :  { %v279_v61 = vld [vmem:[#allocation3] sm:$0xff] }
 0x2d7   :  { %v288_v62 = vadd.f32 %v319_v58, %v279_v61  ;;  %v293_v63 = vadd.f32 %v289_v60, %v448_v1 }
 0x2d9   :  { %v292_v2 = vadd.f32 %v288_v62, %v443_v0  ;;  %295 = vst.msk [vmem:[#allocation4 + $0x8] sm:$0xff] %vm35_vm0, %v293_v63 }
 0x2db   :  { %294 = vst.msk [vmem:[#allocation4] sm:$0xff] %vm35_vm0, %v292_v2 }
 0x2dc   :  { %385 = shalt.err (!%p382_p4)
}
 0x2dd   :  { %s398_s6 = smov 128   ;;  %s399_s10 = smov 8  }
 0x2de   :  { %307 = dma.vmem_to_hbm [thread:$0]  %s302_s8, 256, %s528_s7, [#allocation5], %s398_s6, %s398_s6, %s399_s10  }
 0x2df   :  { %394 = dma.done.wait [#allocation5], 256  }
 0x2e0   :  { %395 = vsyncadd [#allocation5], 4294967040 }
 0x2e1   :  { %311 = vsyncpa [#allocation5], 1 }

// kernel: transformer_decoder_layer.3
= control target key start
LH: loop header
LB: loop body
LE: loop exit
PB: predicated region body
PF: predicated region fallthrough
CT: control target
= control target key end

     0   :  { %s2370_s0 = inlined_call_operand.vmem [shape: f32[2,8,32], index: 0, kind: input, shape index: {}, may-alias: {0,1}]   ;;  %s2371_s1 = inlined_call_operand.vmem [shape: f32[2,8,32], index: 1, kind: input, shape index: {}, may-alias: {0,1}]   ;;  %s2372_s2 = inlined_call_operand.vmem [shape: f32[2,1,8,8], index: 2, kind: input, shape index: {}]   ;;  %s2373_s3 = inlined_call_operand.vmem [shape: f32[1,32], index: 3, kind: input, shape index: {}]   ;;  %s2374_s4 = inlined_call_operand.vmem [shape: f32[1,32], index: 4, kind: input, shape index: {}]   ;;  %s2375_s5 = inlined_call_operand.vmem [shape: f32[1,32,32], index: 5, kind: input, shape index: {}]   ;;  %s2376_s6 = inlined_call_operand.vmem [shape: f32[1,1,32], index: 6, kind: input, shape index: {}]   ;;  %s2377_s7 = inlined_call_operand.vmem [shape: f32[1,32,64], index: 7, kind: input, shape index: {}]   ;;  %s2378_s8 = inlined_call_operand.vmem [shape: f32[1,1,64], index: 8, kind: input, shape index: {}]   ;;  %s2379_s9 = inlined_call_operand.vmem [shape: f32[1,32,32], index: 9, kind: input, shape index: {}]   ;;  %s2380_s10 = inlined_call_operand.vmem [shape: f32[1,32], index: 10, kind: input, shape index: {}]   ;;  %s2381_s11 = inlined_call_operand.vmem [shape: f32[2,8,32], index: 11, kind: output, shape index: {0}]   ;;  %s2382_s12 = inlined_call_operand.hbm [shape: f32[2,4,8,8], index: 12, kind: output, shape index: {1}]  }
   0x1   :  { %2384 = sst [smem:[#allocation7_spill]] %s2370_s0 }
   0x2   :  { %2385 = sst [smem:[#allocation8_spill]] %s2372_s2 }
   0x3   :  { %2386 = sst [smem:[#allocation9_spill]] %s2373_s3 }
   0x4   :  { %18 = vsyncpa [#allocation5], 0 }
   0x5   :  { %20 = vsyncpa [#allocation5 + $0x1], 0  ;;  %s2089_s20 = smov 0   ;;  %s2091_s21 = smov 0  }
   0x6   :  { %s2093_s22 = smov 0   ;;  %s2095_s23 = smov 0  }
   0x7   :  { %s2097_s24 = smov 0   ;;  %s2099_s25 = smov 0  }
   0x8 LB: > { %s1699_s26 = sadd.s32 4294967295, %s2008_s25   ;;  %s1700_s27 = sadd.s32 4294967294, %s2008_s25   ;;  %s2008_s25 = sphi %s2099_s25, %s26_s25   ;;  %s2004_s24 = sphi %s2097_s24, %s2397_s24   ;;  %s2000_s23 = sphi %s2095_s23, %s2396_s23   ;;  %s1996_s22 = sphi %s2093_s22, %s2395_s22   ;;  %s1992_s21 = sphi %s2091_s21, %s2394_s21   ;;  %s1988_s20 = sphi %s2089_s20, %s2393_s20  }
   0x9   : > { %s38_s28 = sadd.s32 1, %s2004_s24  ;;  %s318_s29 = sadd.s32 1, %s1996_s22 }
   0xa   : > { %p40_p0 = scmp.ge.s32.totalorder %s38_s28, 2  ;;  %p328_p1 = scmp.ne.s32.totalorder %s1996_s22, %s1992_s21 }
   0xb   : > { %p329_p2 = scmp.eq.s32.totalorder %s1699_s26, 1  ;;  %p334_p3 = scmp.ne.s32.totalorder %s1992_s21, %s1988_s20 }
   0xc   : > { %s2399_s28 = smov (%p40_p0, %s38_s28), 0  ;;  %p335_p5 = scmp.eq.s32.totalorder %s1700_s27, 1 }
   0xd   : > { %p2129_p4 = por %p329_p2, %p328_p1  ;;  %s313_s30 = ssub.s32 %s2004_s24, %s2399_s28 }
   0xe   : > { %p1708_p6 = scmp.ge.s32.totalorder %s2008_s25, 1  ;;  %p316_p7 = scmp.eq.s32.totalorder %s313_s30, 0 }
   0xf   : > { %p2136_p8 = por %p335_p5, %p334_p3  ;;  %p412_p9 = scmp.lt.s32.totalorder %s2008_s25, 3 }
  0x10   : > { %s2142_s14 = scalar_select %p316_p7, %s1996_s22, %s318_s29  }
  0x11   : > { %p413_p10 = pnand %p1708_p6, %p412_p9 }
  0x12   : > { %p480_p11 = scmp.lt.s32.totalorder (!%p413_p10), %s2000_s23, 1  ;;  %s2389_s0 = sld [smem:[#allocation7_spill]] (!%p413_p10) }
  0x13   : > { %416 = sbr.rel (%p413_p10) target bundleno = 1695 (0x69f), region = 60  ;;  %s2390_s3 = sld [smem:[#allocation9_spill]] (!%p413_p10) }
  0x14   : > { %s2012_s26 = smov (!%p413_p10), 112   ;;  %s2013_s27 = smov (!%p413_p10), 120  }
  0x15   : > { %s2014_s29 = smov (!%p413_p10), 104   ;;  %s2391_s2 = sld [smem:[#allocation8_spill]] (!%p413_p10) }
  0x16   : > { %s2015_s18 = smov (!%p413_p10), 88  }
  0x18   : > { %s481_s15 = scalar_select %p480_p11, %s2000_s23, 1  ;;  %vm521_vm0 = vcmask 261120   ;;  %v2010_v7 = vmov 0.0   ;;  %v556_v8 = vld [vmem:[%s2375_s5 + $0x18] sm:$0xff]  ;;  %v555_v10 = vld [vmem:[%s2375_s5 + $0x10] sm:$0xff]  ;;  %v554_v12 = vld [vmem:[%s2375_s5 + $0x8] sm:$0xff] }
  0x19   : > { %1773 = vmatprep.subr.mxu0 %v2010_v7  ;;  %551 = vst.msk [vmem:[#allocation3] sm:$0xff] %vm521_vm0, %v2010_v7  ;;  %1784 = vmatprep.subr.mxu1 %v2010_v7  ;;  %v641_v9 = vld [vmem:[%s2377_s7 + $0x18] sm:$0xff]  ;;  %v640_v11 = vld [vmem:[%s2377_s7 + $0x10] sm:$0xff]  ;;  %v639_v13 = vld [vmem:[%s2377_s7 + $0x8] sm:$0xff]  ;;  %vm2011_vm1 = vmmov 0   ;;  %vm720_vm2 = vcmask 64512  }
  0x1a   : > { %s2146_s16 = sshll.u32 %s481_s15, 3  ;;  %1774 = vmatpush3.msra.mxu0 %v556_v8  ;;  %1785 = vmatpush3.msra.mxu1 %v641_v9  ;;  %v553_v14 = vld [vmem:[%s2375_s5] sm:$0xff]  ;;  %vm1399_vm3 = vcmask 130048   ;;  %vm1401_vm4 = vcmask 195584  }
  0x1b   : > { %s483_s19 = scalar_lea.vmem %s2389_s0, %s2146_s16  ;;  %1775 = vmatprep.subr.mxu0 %v2010_v7  ;;  %1786 = vmatprep.subr.mxu1 %v2010_v7  ;;  %v638_v15 = vld [vmem:[%s2377_s7] sm:$0xff]  ;;  %s487_s17 = scalar_lea.vmem %s2391_s2, %s2146_s16 }
  0x1c   : > { %v2152_v0 = vld [vmem:[%s483_s19] sm:$0xff]  ;;  %1776 = vmatpush3.msra.mxu0 %v555_v10  ;;  %1787 = vmatpush3.msra.mxu1 %v640_v11  ;;  %s2016_s19 = smov 96  }
  0x1d   : > { %v522_v1 = vsel %vm521_vm0, %v2152_v0, 0.0  ;;  %1777 = vmatprep.subr.mxu0 %v2010_v7  ;;  %1788 = vmatprep.subr.mxu1 %v2010_v7  ;;  %v1713_v20 = vld [vmem:[%s2390_s3] ss:$0 sm:$0xff] }
  0x1e   : > { %523 = vadd.xlane.f32.xlu0 %v522_v1  ;;  %1778 = vmatpush3.msra.mxu0 %v554_v12  ;;  %v1714_v22 = vld [vmem:[%s2374_s4] ss:$0 sm:$0xff] }
  0x1f   : > { %1789 = vmatpush3.msra.mxu1 %v639_v13  ;;  %1779 = vmatprep.subr.mxu0 %v2010_v7  ;;  %v1717_v26 = vld [vmem:[%s2378_s8] ss:$0 sm:$0xff] }
  0x20   : > { %1790 = vmatprep.subr.mxu1 %v2010_v7  ;;  %1780 = vmatpush3.msra.mxu0 %v553_v14  ;;  %v1715_v30 = vld [vmem:[%s2376_s6] ss:$0 sm:$0xff] }
  0x21   : > { %1781 = vmatprep.mubr.msk.f32.mxu0 %vm2011_vm1, %v2010_v7  ;;  %1791 = vmatpush3.msra.mxu1 %v638_v15  ;;  %v719_v40 = vld [vmem:[%s487_s17] sm:$0xff] }
  0x22   : > { %1792 = vmatprep.mubr.msk.f32.mxu1 %vm2011_vm1, %v2010_v7  ;;  %1795 = vmatprep.subr.mxu1 %v2010_v7 }
  0x23   : > { %1805 = vmatprep.subr.mxu0 %v2010_v7 }
  0xa7   : > { %v524_v2 = vpop.xlane.xlu0 %523 }
  0xa8   : > { %v526_v3 = vmul.f32 0.03125, %v524_v2 }
  0xaa   : > { %v527_v4 = vsub.f32 %v2152_v0, %v526_v3 }
  0xac   : > { %v528_v5 = vmul.f32 %v527_v4, %v527_v4 }
  0xae   : > { %v529_v6 = vsel %vm521_vm0, %v528_v5, 0.0 }
  0xaf   : > { %530 = vadd.xlane.f32.xlu0 %v529_v6 }
 0x138   : > { %v531_v16 = vpop.xlane.xlu0 %530 }
 0x139   : > { %v532_v17 = vmul.f32 0.03125, %v531_v16 }
 0x13b   : > { %v533_v18 = vadd.f32 1e-05, %v532_v17 }
 0x13d   : > { %1914 = vrsqrt.f32 %v533_v18 }
 0x14a   : > { %v1915_v19 = vpop.eup %1914 }
 0x14b   : > { %v535_v21 = vmul.f32 %v1915_v19, %v527_v4 }
 0x14d   : > { %v542_v23 = vmul.f32 %v1713_v20, %v535_v21 }
 0x14f   : > { %v549_v24 = vadd.f32 %v1714_v22, %v542_v23 }
 0x151   : > { %550 = vst.msk [vmem:[#allocation2] sm:$0xff] %vm521_vm0, %v549_v24 }
 0x158   : > { %v552_v25 = vld [vmem:[#allocation2] sm:$0xff] }
 0x159   : > { %1782 = vmatmul.mubr.msk.f32.vlgmr.msra.gmra.mxu0 %vm521_vm0, %v552_v25  ;;  %1793 = vmatmul.mubr.msk.f32.vlgmr.msra.gmra.mxu1 %vm521_vm0, %v552_v25 }
 0x15a   : > { %1797 = vmatprep.mubr.msk.f32.mxu1 %vm2011_vm1, %v2010_v7  ;;  %1807 = vmatprep.mubr.msk.f32.mxu0 %vm2011_vm1, %v2010_v7 }
 0x219   : > { %v634_v27 = vpop.f32.mrf.mxu0  ;;  %v715_v28 = vpop.f32.mrf.mxu1 }
 0x21a   : > { %v2214_v29 = vadd.f32 %v1717_v26, %v715_v28  ;;  %v635_v33 = vadd.f32 %v1715_v30, %v634_v27 }
 0x21b   : > { %v1783_v31 = vpop.f32.mrf.mxu0  ;;  %v1794_v32 = vpop.f32.mrf.mxu1 }
 0x21c   : > { %1054 = vrot.lane.b32.xlu0 %v2214_v29, %s2012_s26  ;;  %887 = vrot.lane.b32.xlu1 %v2214_v29, %s2013_s27 }
 0x21d   : > { %1796 = vmatpush3.xpose.msk.msra.mxu1 %vm720_vm2, %v2214_v29 }
 0x21e   : > { %1800 = vmatprep.subr.mxu1 %v2010_v7 }
 0x220   : > { %1798 = vmatmul.mubr.msk.f32.vlgmr.msra.gmra.mxu1 %vm720_vm2, %v635_v33  ;;  %885 = vrot.lane.b32.xlu1 %v635_v33, %s2013_s27  ;;  %s2018_s27 = smov 80  }
 0x221   : > { %1802 = vmatprep.mubr.msk.f32.mxu1 %vm2011_vm1, %v2010_v7 }
 0x224   : > { %1052 = vrot.lane.b32.xlu1 %v635_v33, %s2012_s26  ;;  %s2017_s26 = smov 72  }
 0x228   : > { %1221 = vrot.lane.b32.xlu1 %v2214_v29, %s2014_s29 }
 0x22c   : > { %1219 = vrot.lane.b32.xlu1 %v635_v33, %s2014_s29  ;;  %s477_s29 = sand.u32 1, %s1992_s21   ;;  %v1407_v33 = vld [vmem:[%s2379_s9 + $0x18] sm:$0xff] }
 0x22d   : > { %s1709_s30 = sshll.u32 %s477_s29, 5 }
 0x22e   : > { %s2263_s15 = scalar_lea.vmem [#allocation4], %s1709_s30  ;;  %s1741_s30 = sshll.u32 %s2000_s23, 9 }
 0x22f   : > { %s2022_s23 = smov [#allocation4]  }
 0x230   : > { %s1936_s2 = sshll.u32 %s2022_s23, 4  ;;  %s1937_s2 = int_to_ptr.vmem [resolvable:$false] %s1936_s2 }
 0x231   : > { %s1938_s17 = scalar_lea.vmem %s1937_s2, 1024 }
 0x28e   : > { %v888_v34 = vpop.permute.xlu1 %887  ;;  %v1055_v36 = vpop.permute.xlu0 %1054 }
 0x28f   : > { %1806 = vmatpush3.xpose.msk.msra.mxu0 %vm720_vm2, %v888_v34  ;;  %v1406_v34 = vld [vmem:[%s2379_s9 + $0x10] sm:$0xff] }
 0x290   : > { %1815 = vmatprep.subr.mxu0 %v2010_v7 }
 0x292   : > { %v886_v35 = vpop.permute.xlu1 %885 }
 0x293   : > { %1808 = vmatmul.mubr.msk.f32.vlgmr.msra.gmra.mxu0 %vm720_vm2, %v886_v35  ;;  %v1405_v35 = vld [vmem:[%s2379_s9 + $0x8] sm:$0xff] }
 0x294   : > { %1816 = vmatpush3.xpose.msk.msra.mxu0 %vm720_vm2, %v1055_v36  ;;  %1817 = vmatprep.mubr.msk.f32.mxu0 %vm2011_vm1, %v2010_v7 }
 0x295   : > { %1825 = vmatprep.subr.mxu0 %v2010_v7 }
 0x296   : > { %v1053_v37 = vpop.permute.xlu1 %1052 }
 0x297   : > { %1818 = vmatmul.mubr.msk.f32.vlgmr.msra.gmra.mxu0 %vm720_vm2, %v1053_v37  ;;  %v1404_v37 = vld [vmem:[%s2379_s9] sm:$0xff] }
 0x298   : > { %1827 = vmatprep.mubr.msk.f32.mxu0 %vm2011_vm1, %v2010_v7 }
 0x29a   : > { %v1222_v38 = vpop.permute.xlu1 %1221 }
 0x29b   : > { %1826 = vmatpush3.xpose.msk.msra.mxu0 %vm720_vm2, %v1222_v38 }
 0x29c   : > { %1835 = vmatprep.subr.mxu0 %v2010_v7 }
 0x29e   : > { %v1220_v39 = vpop.permute.xlu1 %1219 }
 0x29f   : > { %1828 = vmatmul.mubr.msk.f32.vlgmr.msra.gmra.mxu0 %vm720_vm2, %v1220_v39 }
 0x2a0   : > { %1843 = vmatprep.mubr.msk.f32.mxu0 %vm2011_vm1, %v2010_v7  ;;  %1836 = vmatpush3.msra.mxu0 %v1407_v33 }
 0x2a1   : > { %1837 = vmatprep.subr.mxu0 %v2010_v7 }
 0x2a2   : > { %1838 = vmatpush3.msra.mxu0 %v1406_v34 }
 0x2a3   : > { %1839 = vmatprep.subr.mxu0 %v2010_v7 }
 0x2a4   : > { %1840 = vmatpush3.msra.mxu0 %v1405_v35 }
 0x2a5   : > { %1841 = vmatprep.subr.mxu0 %v2010_v7 }
 0x2a6   : > { %1842 = vmatpush3.msra.mxu0 %v1404_v37 }
 0x2e0   : > { %v793_v41 = vpop.f32.mrf.mxu1 }
 0x2e1   : > { %v794_v42 = vadd.f32 %v793_v41, %v719_v40 }
 0x2e2   : > { %v1799_v43 = vpop.f32.mrf.mxu1 }
 0x2e3   : > { %v797_v44 = vsel %vm720_vm2, %v794_v42, -inf }
 0x2e4   : > { %798 = vmax.xlane.f32.xlu1 %v797_v44 }
 0x353   : > { %v959_v45 = vpop.f32.mrf.mxu0 }
 0x354   : > { %v960_v46 = vadd.f32 %v959_v45, %v719_v40 }
 0x355   : > { %v1809_v47 = vpop.f32.mrf.mxu0 }
 0x356   : > { %v963_v48 = vsel %vm720_vm2, %v960_v46, -inf }
 0x357   : > { %964 = vmax.xlane.f32.xlu0 %v963_v48  ;;  %v1126_v49 = vpop.f32.mrf.mxu0 }
 0x358   : > { %v1127_v50 = vadd.f32 %v1126_v49, %v719_v40 }
 0x359   : > { %v1819_v51 = vpop.f32.mrf.mxu0 }
 0x35a   : > { %v1130_v52 = vsel %vm720_vm2, %v1127_v50, -inf }
 0x35b   : > { %1131 = vmax.xlane.f32.xlu1 %v1130_v52 }
 0x35f   : > { %v1293_v53 = vpop.f32.mrf.mxu0 }
 0x360   : > { %v1294_v54 = vadd.f32 %v1293_v53, %v719_v40 }
 0x361   : > { %v1829_v55 = vpop.f32.mrf.mxu0 }
 0x362   : > { %v1297_v56 = vsel %vm720_vm2, %v1294_v54, -inf }
 0x363   : > { %1298 = vmax.xlane.f32.xlu1 %v1297_v56 }
 0x36d   : > { %v799_v57 = vpop.xlane.xlu1 %798 }
 0x36e   : > { %v800_v58 = vsub.f32 %v794_v42, %v799_v57 }
 0x370   : > { %v801_v59 = vmul.f32 1.442695, %v800_v58 }
 0x372   : > { %1916 = vpow2.f32 %v801_v59 }
 0x374   : > { %976 = vrot.lane.b32.xlu1 %v2214_v29, %s2015_s18 }
 0x37f   : > { %v1917_v60 = vpop.eup %1916 }
 0x380   : > { %v803_v61 = vsel %vm720_vm2, %v1917_v60, 0.0 }
 0x381   : > { %804 = vadd.xlane.f32.xlu0 %v803_v61 }
 0x397   : > { %809 = vrot.lane.b32.xlu0 %v2214_v29, %s2016_s19  ;;  %s2383_s19 = smov 8  }
 0x3e0   : > { %v965_v62 = vpop.xlane.xlu0 %964 }
 0x3e1   : > { %v966_v63 = vsub.f32 %v960_v46, %v965_v62 }
 0x3e3   : > { %v967_v1 = vmul.f32 1.442695, %v966_v63 }
 0x3e4   : > { %v1132_v2 = vpop.xlane.xlu1 %1131 }
 0x3e5   : > { %1918 = vpow2.f32 %v967_v1  ;;  %v1133_v3 = vsub.f32 %v1127_v50, %v1132_v2 }
 0x3e7   : > { %v1134_v4 = vmul.f32 1.442695, %v1133_v3 }
 0x3e9   : > { %1920 = vpow2.f32 %v1134_v4 }
 0x3ec   : > { %v1299_v5 = vpop.xlane.xlu1 %1298 }
 0x3ed   : > { %v1300_v6 = vsub.f32 %v1294_v54, %v1299_v5 }
 0x3ef   : > { %v1301_v8 = vmul.f32 1.442695, %v1300_v6 }
 0x3f0   : > { %v977_v19 = vpop.permute.xlu1 %976 }
 0x3f1   : > { %1922 = vpow2.f32 %v1301_v8 }
 0x3f2   : > { %v1919_v9 = vpop.eup %1918 }
 0x3f3   : > { %v969_v10 = vsel %vm720_vm2, %v1919_v9, 0.0 }
 0x3f4   : > { %970 = vadd.xlane.f32.xlu1 %v969_v10 }
 0x3f6   : > { %v1921_v11 = vpop.eup %1920 }
 0x3f7   : > { %v1136_v12 = vsel %vm720_vm2, %v1921_v11, 0.0 }
 0x3f8   : > { %1137 = vadd.xlane.f32.xlu0 %v1136_v12 }
 0x3fe   : > { %v1923_v13 = vpop.eup %1922 }
 0x3ff   : > { %v1303_v14 = vsel %vm720_vm2, %v1923_v13, 0.0 }
 0x400   : > { %1304 = vadd.xlane.f32.xlu1 %v1303_v14 }
 0x40a   : > { %v805_v15 = vpop.xlane.xlu0 %804 }
 0x40b   : > { %1924 = vrcp.f32 %v805_v15 }
 0x40e   : > { %v810_v16 = vpop.permute.xlu0 %809  ;;  %1310 = vrot.lane.b32.xlu0 %v2214_v29, %s2017_s26  ;;  %s2020_s26 = smov 16  }
 0x40f   : > { %1801 = vmatpush3.msra.mxu1 %v810_v16 }
 0x410   : > { %1810 = vmatprep.subr.mxu1 %v2010_v7 }
 0x411   : > { %1143 = vrot.lane.b32.xlu1 %v2214_v29, %s2018_s27  ;;  %s2021_s27 = smov 24  }
 0x418   : > { %v1925_v17 = vpop.eup %1924 }
 0x419   : > { %v807_v18 = vmul.f32 %v1925_v17, %v1917_v60 }
 0x41b   : > { %808 = vst.msk [vmem:[%s2263_s15] sm:$0xff] %vm720_vm2, %v807_v18  ;;  %1803 = vmatmul.mubr.msk.f32.vlgmr.msra.gmra.mxu1 %vm720_vm2, %v807_v18 }
 0x41c   : > { %1811 = vmatpush3.msra.mxu1 %v977_v19  ;;  %1812 = vmatprep.mubr.msk.f32.mxu1 %vm2011_vm1, %v2010_v7 }
 0x41d   : > { %1820 = vmatprep.subr.mxu1 %v2010_v7 }
 0x47d   : > { %v971_v20 = vpop.xlane.xlu1 %970 }
 0x47e   : > { %1926 = vrcp.f32 %v971_v20 }
 0x481   : > { %v1138_v21 = vpop.xlane.xlu0 %1137 }
 0x482   : > { %1928 = vrcp.f32 %v1138_v21 }
 0x485   : > { %v1311_v28 = vpop.permute.xlu0 %1310 }
 0x489   : > { %v1305_v22 = vpop.xlane.xlu1 %1304 }
 0x48a   : > { %1930 = vrcp.f32 %v1305_v22 }
 0x48b   : > { %v1927_v23 = vpop.eup %1926 }
 0x48c   : > { %v973_v24 = vmul.f32 %v1927_v23, %v1919_v9 }
 0x48d   : > { %v1144_v25 = vpop.permute.xlu1 %1143 }
 0x48e   : > { %1724 = vst.msk [vmem:[%s2263_s15 + $0x8] sm:$0xff] %vm720_vm2, %v973_v24  ;;  %1813 = vmatmul.mubr.msk.f32.vlgmr.msra.gmra.mxu1 %vm720_vm2, %v973_v24 }
 0x48f   : > { %v1929_v26 = vpop.eup %1928  ;;  %1821 = vmatpush3.msra.mxu1 %v1144_v25  ;;  %1822 = vmatprep.mubr.msk.f32.mxu1 %vm2011_vm1, %v2010_v7 }
 0x490   : > { %1830 = vmatprep.subr.mxu1 %v2010_v7  ;;  %v1140_v27 = vmul.f32 %v1929_v26, %v1921_v11 }
 0x492   : > { %1728 = vst.msk [vmem:[%s2263_s15 + $0x10] sm:$0xff] %vm720_vm2, %v1140_v27  ;;  %1823 = vmatmul.mubr.msk.f32.vlgmr.msra.gmra.mxu1 %vm720_vm2, %v1140_v27 }
 0x493   : > { %1831 = vmatpush3.msra.mxu1 %v1311_v28  ;;  %1832 = vmatprep.mubr.msk.f32.mxu1 %vm2011_vm1, %v2010_v7 }
 0x497   : > { %v1931_v29 = vpop.eup %1930 }
 0x498   : > { %v1307_v30 = vmul.f32 %v1931_v29, %v1923_v13 }
 0x49a   : > { %1732 = vst.msk [vmem:[%s2263_s15 + $0x18] sm:$0xff] %vm720_vm2, %v1307_v30  ;;  %1833 = vmatmul.mubr.msk.f32.vlgmr.msra.gmra.mxu1 %vm720_vm2, %v1307_v30 }
 0x4db   : > { %v881_v31 = vpop.f32.mrf.mxu1 }
 0x4dd   : > { %v1804_v32 = vpop.f32.mrf.mxu1 }
 0x54e   : > { %v1048_v36 = vpop.f32.mrf.mxu1 }
 0x54f   : > { %1387 = vrot.lane.b32.xlu1 %v1048_v36, %s2383_s19  ;;  %s2314_s19 = scalar_lea.sflag [#allocation5], %s477_s29 }
 0x550   : > { %v1814_v38 = vpop.f32.mrf.mxu1 }
 0x552   : > { %v1215_v39 = vpop.f32.mrf.mxu1 }
 0x553   : > { %1391 = vrot.lane.b32.xlu0 %v1215_v39, %s2020_s26  ;;  %s2307_s26 = scalar_lea.hbm %s2382_s12, %s1741_s30 }
 0x554   : > { %v1824_v40 = vpop.f32.mrf.mxu1 }
 0x55a   : > { %v1382_v41 = vpop.f32.mrf.mxu1 }
 0x55b   : > { %1395 = vrot.lane.b32.xlu1 %v1382_v41, %s2021_s27  ;;  %s1521_s27 = sshll.u32 %s2263_s15, 4  ;;  %s2310_s27 = int_to_ptr.vmem [resolvable:$true] %s1521_s27 }
 0x55c   : > { %v1834_v7 = vpop.f32.mrf.mxu1  ;;  %s1932_s0 = scalar_lea.vmem %s2310_s27, 512  ;;  %p1939_p1 = scmp.lt.s32.totalorder %s2310_s27, %s1937_s2 }
 0x55d   : > { %p1933_p12 = scmp.ne.s32.totalorder %s2310_s27, %s1932_s0  ;;  %p1940_p2 = scmp.lt.s32.totalorder %s1938_s17, %s1932_s0 }
 0x55f   : > { %p1934_p13 = pnand %p1933_p12, %p2129_p4  ;;  %p1941_p3 = por %p1940_p2, %p1939_p1 }
 0x561   : > { %p1935_p0 = pneg %p1934_p13 }
 0x563   : > { %p1942_p5 = pnand %p1941_p3, %p1935_p0 }
 0x5c1   : > { %v1388_v42 = vpop.permute.xlu1 %1387 }
 0x5c2   : > { %v1398_v44 = vsel %vm720_vm2, %v881_v31, %v1388_v42 }
 0x5c5   : > { %v1392_v43 = vpop.permute.xlu0 %1391 }
 0x5c6   : > { %v1400_v45 = vsel %vm1399_vm3, %v1398_v44, %v1392_v43 }
 0x5cd   : > { %v1396_v46 = vpop.permute.xlu1 %1395 }
 0x5ce   : > { %v1402_v47 = vsel %vm1401_vm4, %v1400_v45, %v1396_v46 }
 0x5cf   : > { %1844 = vmatmul.mubr.msk.f32.vlgmr.msra.gmra.mxu0 %vm521_vm0, %v1402_v47 }
 0x5d0   : > { %1945 = shalt.err (!%p1942_p5)
}
 0x5d1   : > { %s1946_s29 = scalar_lea.hbm %s2307_s26, 512  ;;  %s1950_s18 = scalar_lea.hbm %s2382_s12, 1024 }
 0x5d2   : > { %p1947_p6 = scmp.ne.s32.totalorder %s2307_s26, %s1946_s29  ;;  %p1951_p10 = scmp.lt.s32.totalorder %s2307_s26, %s2382_s12 }
 0x5d3   : > { %p1952_p11 = scmp.lt.s32.totalorder %s1950_s18, %s1946_s29 }
 0x5d4   : > { %p1948_p7 = pnand %p1947_p6, %p2129_p4 }
 0x5d5   : > { %p1953_p12 = por %p1952_p11, %p1951_p10 }
 0x5d6   : > { %p1949_p9 = pneg %p1948_p7 }
 0x5d8   : > { %p1954_p13 = pnand %p1953_p12, %p1949_p9 }
 0x5da   : > { %1957 = shalt.err (!%p1954_p13)
}
 0x5db   : > { %s2023_s0 = smov 128   ;;  %s2392_s2 = smov 8   ;;  %v1403_v48 = vld [vmem:[#allocation3] sm:$0xff]  ;;  %v1735_v52 = vld [vmem:[%s2380_s10] ss:$0 sm:$0xff] }
 0x5dc   : > { %1846 = dma.vmem_to_hbm [thread:$0]  (%p2129_p4), %s2310_s27, 512, %s2307_s26, %s2314_s19, %s2023_s0, %s2023_s0, %s2392_s2  }
 0x5dd   : > { %s512_s15 = scalar_lea.vmem %s2381_s11, %s2146_s16 }
 0x68f   : > { %v1477_v49 = vpop.f32.mrf.mxu0 }
 0x690   : > { %v1481_v50 = vadd.f32 %v1477_v49, %v1403_v48 }
 0x691   : > { %v1845_v51 = vpop.f32.mrf.mxu0 }
 0x692   : > { %1482 = vst.msk [vmem:[#allocation3] sm:$0xff] %vm521_vm0, %v1481_v50 }
 0x699   : > { %v1486_v53 = vld [vmem:[#allocation3] sm:$0xff] }
 0x69a   : > { %v1494_v54 = vadd.f32 %v1735_v52, %v1486_v53 }
 0x69c   : > { %v1496_v55 = vadd.f32 %v1494_v54, %v2152_v0 }
 0x69e   : > { %1497 = vst.msk [vmem:[%s512_s15] sm:$0xff] %vm521_vm0, %v1496_v55 }
 0x69f PF: > { %p1852_p4 = scmp.ge.s32.totalorder %s2008_s25, 2  ;;  %s1543_s19 = sand.u32 1, %s1988_s20  }
 0x6a0   : > { %s1544_s26 = scalar_lea.sflag [#allocation5], %s1543_s19 }
 0x6a1   : > { %p1849_p0 = pnand %p1852_p4, %p2136_p8 }
 0x6a3   : > { %p1850_p1 = pneg %p1849_p0 }
 0x6a5   : > { %1983 = dma.done.wait (%p1850_p1), %s1544_s26, 512  }
 0x6a6   : > { %1985 = vsyncadd (%p1850_p1), %s1544_s26, 4294966784  ;;  %s26_s25 = sadd.s32 1, %s2008_s25   ;;  %s2393_s20 = smov %s1992_s21 }
 0x6a7   : > { %p23_p2 = scmp.ge.s32.totalorder %s26_s25, 4   ;;  %s2394_s21 = smov %s1996_s22 }
 0x6a8   : > { %s2395_s22 = smov %s2142_s14  ;;  %s2396_s23 = smov %s2004_s24 }
 0x6a9   : > { %s2397_s24 = smov %s2399_s28  ;;  %25 = sbr.rel (!%p23_p2) target bundleno = 8 (0x8), region = 136 }
 0x6ae   :  { %1549 = vsyncpa [#allocation5], 1 }
 0x6af   :  { %1551 = vsyncpa [#allocation5 + $0x1], 1 }

// kernel: transformer_decoder_layer.4
= control target key start
LH: loop header
LB: loop body
LE: loop exit
PB: predicated region body
PF: predicated region fallthrough
CT: control target
= control target key end

     0   :  { %s2542_s0 = inlined_call_operand.vmem [shape: f32[2,8,32], index: 0, kind: input, shape index: {}]   ;;  %s2543_s1 = inlined_call_operand.vmem [shape: f32[2,16,32], index: 1, kind: input, shape index: {}]   ;;  %s2544_s2 = inlined_call_operand.vmem [shape: f32[2,1,8,16], index: 2, kind: input, shape index: {}]   ;;  %s2545_s3 = inlined_call_operand.vmem [shape: f32[1,32], index: 3, kind: input, shape index: {}]   ;;  %s2546_s4 = inlined_call_operand.vmem [shape: f32[1,32], index: 4, kind: input, shape index: {}]   ;;  %s2547_s5 = inlined_call_operand.vmem [shape: f32[1,32,32], index: 5, kind: input, shape index: {}]   ;;  %s2548_s6 = inlined_call_operand.vmem [shape: f32[1,1,32], index: 6, kind: input, shape index: {}]   ;;  %s2549_s7 = inlined_call_operand.vmem [shape: f32[1,32,64], index: 7, kind: input, shape index: {}]   ;;  %s2550_s8 = inlined_call_operand.vmem [shape: f32[1,1,64], index: 8, kind: input, shape index: {}]   ;;  %s2551_s9 = inlined_call_operand.vmem [shape: f32[1,32,32], index: 9, kind: input, shape index: {}]   ;;  %s2552_s10 = inlined_call_operand.vmem [shape: f32[1,32], index: 10, kind: input, shape index: {}]   ;;  %s2553_s11 = inlined_call_operand.vmem [shape: f32[2,8,32], index: 11, kind: output, shape index: {0}]   ;;  %s2554_s12 = inlined_call_operand.hbm [shape: f32[2,4,8,16], index: 12, kind: output, shape index: {1}]  }
   0x1   :  { %2558 = sst [smem:[#allocation10_spill]] %s2542_s0 }
   0x2   :  { %18 = vsyncpa [#allocation5], 0 }
   0x3   :  { %20 = vsyncpa [#allocation5 + $0x1], 0  ;;  %s2220_s21 = smov 0   ;;  %s2222_s22 = smov 0  }
   0x4   :  { %s2224_s23 = smov 0   ;;  %s2226_s24 = smov 0  }
   0x5   :  { %s2228_s25 = smov 0   ;;  %s2230_s26 = smov 0  }
   0x6 LB: > { %2559 = sst [smem:[#allocation7_spill]] %s2135_s25  ;;  %s1797_s27 = sadd.s32 4294967295, %s2139_s26   ;;  %s2139_s26 = sphi %s2230_s26, %s26_s26   ;;  %s2135_s25 = sphi %s2228_s25, %s2568_s25   ;;  %s2131_s24 = sphi %s2226_s24, %s2567_s24   ;;  %s2127_s23 = sphi %s2224_s23, %s2571_s23   ;;  %s2123_s22 = sphi %s2222_s22, %s2570_s22   ;;  %s2119_s21 = sphi %s2220_s21, %s2569_s21  }
   0x7   : > { %s1798_s28 = sadd.s32 4294967294, %s2139_s26   ;;  %s38_s29 = sadd.s32 1, %s2135_s25 }
   0x8   : > { %s344_s30 = sadd.s32 1, %s2127_s23  ;;  %p40_p0 = scmp.ge.s32.totalorder %s38_s29, 2 }
   0x9   : > { %p354_p1 = scmp.ne.s32.totalorder %s2127_s23, %s2123_s22  ;;  %p355_p2 = scmp.eq.s32.totalorder %s1797_s27, 1 }
   0xa   : > { %p360_p3 = scmp.ne.s32.totalorder %s2123_s22, %s2119_s21  ;;  %s2573_s29 = smov (%p40_p0, %s38_s29), 0 }
   0xb   : > { %2560 = sst [smem:[#allocation8_spill]] %s2573_s29  ;;  %p2260_p4 = por %p355_p2, %p354_p1 }
   0xc   : > { %p361_p5 = scmp.eq.s32.totalorder %s1798_s28, 1  ;;  %s339_s14 = ssub.s32 %s2135_s25, %s2573_s29 }
   0xd   : > { %p1806_p6 = scmp.ge.s32.totalorder %s2139_s26, 1  ;;  %p342_p7 = scmp.eq.s32.totalorder %s339_s14, 0 }
   0xe   : > { %p2267_p8 = por %p361_p5, %p360_p3  ;;  %p446_p9 = scmp.lt.s32.totalorder %s2139_s26, 3 }
   0xf   : > { %s2273_s16 = scalar_select %p342_p7, %s2127_s23, %s344_s30  }
  0x10   : > { %p447_p10 = pnand %p1806_p6, %p446_p9 }
  0x11   : > { %2563 = sst [smem:[#allocation9_spill]] %s2273_s16  ;;  %p521_p11 = scmp.lt.s32.totalorder (!%p447_p10), %s2131_s24, 1 }
  0x12   : > { %450 = sbr.rel (%p447_p10) target bundleno = 2597 (0xa25), region = 64  ;;  %s2564_s0 = sld [smem:[#allocation10_spill]] (!%p447_p10) }
  0x13   : > { %s2145_s30 = smov (!%p447_p10), 120   ;;  %s518_s25 = sand.u32 (!%p447_p10), 1, %s2123_s22  }
  0x14   : > { %s1807_s29 = sshll.u32 (!%p447_p10), %s518_s25, 5  ;;  %s2148_s14 = smov (!%p447_p10), 104  }
  0x15   : > { %s2149_s19 = smov (!%p447_p10), 72   ;;  %s2557_s20 = smov (!%p447_p10), 8  }
  0x17   : > { %s522_s17 = scalar_select %p521_p11, %s2131_s24, 1  ;;  %vm567_vm0 = vcmask 261120   ;;  %v689_v7 = vld [vmem:[%s2549_s7 + $0x18] sm:$0xff]  ;;  %v688_v8 = vld [vmem:[%s2549_s7 + $0x10] sm:$0xff]  ;;  %v687_v9 = vld [vmem:[%s2549_s7 + $0x8] sm:$0xff]  ;;  %v2141_v13 = vmov 0.0  }
  0x18   : > { %1899 = vmatprep.subr.mxu1 %v689_v7  ;;  %v686_v10 = vld [vmem:[%s2549_s7] sm:$0xff]  ;;  %1888 = vmatprep.subr.mxu0 %v2141_v13  ;;  %597 = vst.msk [vmem:[#allocation3] sm:$0xff] %vm567_vm0, %v2141_v13  ;;  %v604_v14 = vld [vmem:[%s2547_s5 + $0x18] sm:$0xff]  ;;  %v603_v15 = vld [vmem:[%s2547_s5 + $0x10] sm:$0xff]  ;;  %vm2142_vm1 = vmmov 0   ;;  %vm779_vm2 = vcmask 64512  }
  0x19   : > { %s2277_s18 = sshll.u32 %s522_s17, 3  ;;  %1900 = vmatpush3.msra.mxu1 %v689_v7  ;;  %1889 = vmatpush3.msra.mxu0 %v604_v14  ;;  %v602_v16 = vld [vmem:[%s2547_s5 + $0x8] sm:$0xff]  ;;  %v601_v17 = vld [vmem:[%s2547_s5] sm:$0xff]  ;;  %vm859_vm3 = vcmask 130048   ;;  %vm1487_vm4 = vcmask 195584  }
  0x1a   : > { %s524_s27 = scalar_lea.vmem %s2564_s0, %s2277_s18  ;;  %1901 = vmatprep.subr.mxu1 %v688_v8  ;;  %s1846_s0 = sshll.u32 %s522_s17, 4  ;;  %1896 = vmatprep.mubr.msk.f32.mxu0 %vm2142_vm1, %v2141_v13  ;;  %v1813_v22 = vld [vmem:[%s2545_s3] ss:$0 sm:$0xff] }
  0x1b   : > { %v2283_v0 = vld [vmem:[%s524_s27] sm:$0xff]  ;;  %1902 = vmatpush3.msra.mxu1 %v688_v8  ;;  %s529_s16 = scalar_lea.vmem %s2543_s1, %s1846_s0  ;;  %1890 = vmatprep.subr.mxu0 %v2141_v13  ;;  %s2143_s0 = smov 96  }
  0x1c   : > { %v568_v1 = vsel %vm567_vm0, %v2283_v0, 0.0  ;;  %1903 = vmatprep.subr.mxu1 %v687_v9  ;;  %v599_v11 = vld [vmem:[%s529_s16] sm:$0xff]  ;;  %v600_v12 = vld [vmem:[%s529_s16 + $0x8] sm:$0xff]  ;;  %1891 = vmatpush3.msra.mxu0 %v603_v15  ;;  %s2144_s16 = smov 112   ;;  %s533_s28 = scalar_lea.vmem %s2544_s2, %s2277_s18 }
  0x1d   : > { %569 = vadd.xlane.f32.xlu0 %v568_v1  ;;  %1904 = vmatpush3.msra.mxu1 %v687_v9  ;;  %v1814_v24 = vld [vmem:[%s2546_s4] ss:$0 sm:$0xff]  ;;  %s2396_s17 = scalar_lea.vmem [#allocation4], %s1807_s29  ;;  %s2151_s27 = smov 16  }
  0x1e   : > { %1905 = vmatprep.subr.mxu1 %v686_v10  ;;  %1907 = vmatprep.mubr.msk.f32.mxu1 %vm567_vm0, %v599_v11  ;;  %v1817_v28 = vld [vmem:[%s2550_s8] ss:$0 sm:$0xff]  ;;  %s1607_s29 = sshll.u32 %s2396_s17, 4  ;;  %s2482_s29 = int_to_ptr.vmem [resolvable:$true] %s1607_s29 }
  0x1f   : > { %1906 = vmatpush3.msra.mxu1 %v686_v10  ;;  %1892 = vmatprep.subr.mxu0 %v2141_v13  ;;  %v1815_v34 = vld [vmem:[%s2548_s6] ss:$0 sm:$0xff] }
  0x20   : > { %1908 = vmatmul.mubr.msk.f32.vlgmr.msra.gmra.mxu1 %vm567_vm0, %v600_v12  ;;  %1917 = vmatprep.subr.mxu1 %v2141_v13  ;;  %v2377_v40 = vld [vmem:[%s533_s28] sm:$0xff]  ;;  %s2152_s28 = smov 24  }
  0x21   : > { %1921 = vmatprep.mubr.msk.f32.mxu1 %vm2142_vm1, %v2141_v13  ;;  %1893 = vmatpush3.msra.mxu0 %v602_v16 }
  0x22   : > { %1894 = vmatprep.subr.mxu0 %v2141_v13 }
  0x23   : > { %1895 = vmatpush3.msra.mxu0 %v601_v17 }
  0x24   : > { %1910 = vmatprep.subr.mxu0 %v2141_v13 }
  0xa6   : > { %v570_v2 = vpop.xlane.xlu0 %569 }
  0xa7   : > { %v572_v3 = vmul.f32 0.03125, %v570_v2 }
  0xa9   : > { %v573_v4 = vsub.f32 %v2283_v0, %v572_v3 }
  0xab   : > { %v574_v5 = vmul.f32 %v573_v4, %v573_v4 }
  0xad   : > { %v575_v6 = vsel %vm567_vm0, %v574_v5, 0.0 }
  0xae   : > { %576 = vadd.xlane.f32.xlu0 %v575_v6 }
  0xe0   : > { %v1909_v29 = vpop.f32.mrf.mxu1 }
  0xe1   : > { %v2343_v30 = vadd.f32 %v1909_v29, %v1817_v28 }
  0xe2   : > { %v769_v31 = vpop.f32.mrf.mxu1 }
  0xe3   : > { %874 = vrot.lane.b32.xlu0 %v2343_v30, %s2143_s0  ;;  %v2349_v32 = vadd.f32 %v1817_v28, %v769_v31 }
  0xe7   : > { %1129 = vrot.lane.b32.xlu0 %v2343_v30, %s2144_s16 }
  0xeb   : > { %1127 = vrot.lane.b32.xlu0 %v2349_v32, %s2144_s16 }
 0x137   : > { %v577_v18 = vpop.xlane.xlu0 %576 }
 0x138   : > { %v578_v19 = vmul.f32 0.03125, %v577_v18 }
 0x13a   : > { %v579_v20 = vadd.f32 1e-05, %v578_v19 }
 0x13c   : > { %2045 = vrsqrt.f32 %v579_v20 }
 0x149   : > { %v2046_v21 = vpop.eup %2045 }
 0x14a   : > { %v581_v23 = vmul.f32 %v2046_v21, %v573_v4 }
 0x14c   : > { %v588_v25 = vmul.f32 %v1813_v22, %v581_v23 }
 0x14e   : > { %v595_v26 = vadd.f32 %v1814_v24, %v588_v25 }
 0x150   : > { %596 = vst.msk [vmem:[#allocation2] sm:$0xff] %vm567_vm0, %v595_v26 }
 0x155   : > { %v875_v33 = vpop.permute.xlu0 %874 }
 0x156   : > { %1918 = vmatpush3.msra.mxu1 %v875_v33 }
 0x157   : > { %v598_v27 = vld [vmem:[#allocation2] sm:$0xff]  ;;  %1919 = vmatprep.subr.mxu1 %v2141_v13 }
 0x158   : > { %1897 = vmatmul.mubr.msk.f32.vlgmr.msra.gmra.mxu0 %vm567_vm0, %v598_v27 }
 0x159   : > { %1914 = vmatprep.mubr.msk.f32.mxu0 %vm2142_vm1, %v2141_v13  ;;  %1911 = vmatpush3.xpose.msk.msra.mxu0 %vm779_vm2, %v2343_v30  ;;  %v1130_v35 = vpop.permute.xlu0 %1129 }
 0x15a   : > { %1912 = vmatprep.subr.mxu0 %v2141_v13 }
 0x15d   : > { %1913 = vmatpush3.xpose.msk.msra.mxu0 %vm779_vm2, %v2349_v32  ;;  %v1128_v39 = vpop.permute.xlu0 %1127 }
 0x15e   : > { %1938 = vmatprep.subr.mxu0 %v2141_v13 }
 0x218   : > { %v682_v36 = vpop.f32.mrf.mxu0 }
 0x219   : > { %v2363_v37 = vadd.f32 %v1815_v34, %v682_v36 }
 0x21a   : > { %v1898_v38 = vpop.f32.mrf.mxu0 }
 0x21b   : > { %1915 = vmatmul.mubr.msk.f32.vlgmr.msra.gmra.mxu0 %vm779_vm2, %v2363_v37 }
 0x21c   : > { %1939 = vmatpush3.xpose.msk.msra.mxu0 %vm779_vm2, %v1130_v35  ;;  %1942 = vmatprep.mubr.msk.f32.mxu0 %vm2142_vm1, %v2141_v13 }
 0x21d   : > { %1940 = vmatprep.subr.mxu0 %v2141_v13 }
 0x220   : > { %1941 = vmatpush3.xpose.msk.msra.mxu0 %vm779_vm2, %v1128_v39 }
 0x221   : > { %1959 = vmatprep.subr.mxu0 %v2141_v13 }
 0x2db   : > { %v855_v41 = vpop.f32.mrf.mxu0 }
 0x2dc   : > { %v856_v42 = vadd.f32 %v855_v41, %v2377_v40 }
 0x2dd   : > { %v1916_v43 = vpop.f32.mrf.mxu0 }
 0x2de   : > { %v860_v44 = vsel %vm859_vm3, %v856_v42, -inf }
 0x2df   : > { %861 = vmax.xlane.f32.xlu1 %v860_v44 }
 0x2f0   : > { %872 = vrot.lane.b32.xlu1 %v2349_v32, %s2143_s0  ;;  %s2146_s0 = smov 88  }
 0x2f4   : > { %955 = vrot.lane.b32.xlu1 %v2343_v30, %s2145_s30 }
 0x2f8   : > { %953 = vrot.lane.b32.xlu1 %v2349_v32, %s2145_s30 }
 0x368   : > { %v862_v45 = vpop.xlane.xlu1 %861 }
 0x369   : > { %v863_v46 = vsub.f32 %v856_v42, %v862_v45 }
 0x36b   : > { %v864_v47 = vmul.f32 1.442695, %v863_v46 }
 0x36c   : > { %v873_v48 = vpop.permute.xlu1 %872 }
 0x36d   : > { %2047 = vpow2.f32 %v864_v47  ;;  %1920 = vmatpush3.msra.mxu1 %v873_v48  ;;  %v1492_v48 = vld [vmem:[%s2551_s9 + $0x10] sm:$0xff] }
 0x36e   : > { %1924 = vmatprep.subr.mxu1 %v2141_v13 }
 0x370   : > { %v956_v51 = vpop.permute.xlu1 %955 }
 0x374   : > { %v954_v52 = vpop.permute.xlu1 %953 }
 0x37a   : > { %v2048_v49 = vpop.eup %2047 }
 0x37b   : > { %v866_v50 = vsel %vm859_vm3, %v2048_v49, 0.0 }
 0x37c   : > { %867 = vadd.xlane.f32.xlu1 %v866_v50  ;;  %v1490_v50 = vld [vmem:[%s2551_s9] sm:$0xff] }
 0x38d   : > { %951 = vrot.lane.b32.xlu1 %v2363_v37, %s2145_s30  ;;  %s1847_s30 = sshll.u32 %s2131_s24, 9  ;;  %s2153_s24 = smov [#allocation4]  }
 0x391   : > { %1125 = vrot.lane.b32.xlu1 %v2363_v37, %s2144_s16  ;;  %s2147_s16 = smov 80  }
 0x405   : > { %v868_v53 = vpop.xlane.xlu1 %867 }
 0x406   : > { %2049 = vrcp.f32 %v868_v53 }
 0x409   : > { %v952_v54 = vpop.permute.xlu1 %951 }
 0x40d   : > { %v1126_v55 = vpop.permute.xlu1 %1125 }
 0x40e   : > { %1943 = vmatmul.mubr.msk.f32.vlgmr.msra.gmra.mxu0 %vm779_vm2, %v1126_v55 }
 0x40f   : > { %1963 = vmatprep.mubr.msk.f32.mxu0 %vm2142_vm1, %v2141_v13 }
 0x413   : > { %v2050_v56 = vpop.eup %2049 }
 0x414   : > { %v870_v57 = vmul.f32 %v2050_v56, %v2048_v49  ;;  %v1491_v49 = vld [vmem:[%s2551_s9 + $0x8] sm:$0xff] }
 0x416   : > { %871 = vst.msk [vmem:[%s2396_s17] sm:$0xff] %vm859_vm3, %v870_v57  ;;  %1922 = vmatmul.mubr.msk.f32.vlgmr.msra.gmra.mxu1 %vm859_vm3, %v870_v57 }
 0x417   : > { %1925 = vmatpush3.xpose.msk.msra.mxu1 %vm779_vm2, %v956_v51  ;;  %1928 = vmatprep.mubr.msk.f32.mxu1 %vm2142_vm1, %v2141_v13 }
 0x418   : > { %1926 = vmatprep.subr.mxu1 %v2141_v13 }
 0x41b   : > { %1927 = vmatpush3.xpose.msk.msra.mxu1 %vm779_vm2, %v954_v52 }
 0x41c   : > { %1931 = vmatprep.subr.mxu1 %v2141_v13 }
 0x41e   : > { %1929 = vmatmul.mubr.msk.f32.vlgmr.msra.gmra.mxu1 %vm779_vm2, %v952_v54 }
 0x41f   : > { %1935 = vmatprep.mubr.msk.f32.mxu1 %vm2142_vm1, %v2141_v13 }
 0x4ce   : > { %v1203_v58 = vpop.f32.mrf.mxu0 }
 0x4cf   : > { %v1204_v59 = vadd.f32 %v1203_v58, %v2377_v40 }
 0x4d0   : > { %v1944_v60 = vpop.f32.mrf.mxu0 }
 0x4d1   : > { %v1207_v61 = vsel %vm859_vm3, %v1204_v59, -inf }
 0x4d2   : > { %1208 = vmax.xlane.f32.xlu1 %v1207_v61 }
 0x4d6   : > { %v2412_v62 = vpop.f32.mrf.mxu1 }
 0x4d8   : > { %v1923_v63 = vpop.f32.mrf.mxu1 }
 0x4de   : > { %v1029_v1 = vpop.f32.mrf.mxu1 }
 0x4df   : > { %v1030_v2 = vadd.f32 %v1029_v1, %v2377_v40 }
 0x4e0   : > { %v1930_v3 = vpop.f32.mrf.mxu1 }
 0x4e1   : > { %v1033_v4 = vsel %vm859_vm3, %v1030_v2, -inf }
 0x4e2   : > { %1034 = vmax.xlane.f32.xlu0 %v1033_v4 }
 0x4e3   : > { %1046 = vrot.lane.b32.xlu1 %v2349_v32, %s2146_s0 }
 0x4e7   : > { %1222 = vrot.lane.b32.xlu1 %v2343_v30, %s2147_s16 }
 0x4eb   : > { %1220 = vrot.lane.b32.xlu1 %v2349_v32, %s2147_s16 }
 0x4ef   : > { %1301 = vrot.lane.b32.xlu1 %v2349_v32, %s2148_s14 }
 0x55b   : > { %v1209_v5 = vpop.xlane.xlu1 %1208 }
 0x55c   : > { %v1210_v6 = vsub.f32 %v1204_v59, %v1209_v5 }
 0x55e   : > { %v1211_v7 = vmul.f32 1.442695, %v1210_v6 }
 0x55f   : > { %v1047_v21 = vpop.permute.xlu1 %1046 }
 0x560   : > { %2051 = vpow2.f32 %v1211_v7 }
 0x563   : > { %v1223_v22 = vpop.permute.xlu1 %1222 }
 0x567   : > { %v1221_v25 = vpop.permute.xlu1 %1220 }
 0x56b   : > { %v1035_v8 = vpop.xlane.xlu0 %1034  ;;  %v1302_v27 = vpop.permute.xlu1 %1301 }
 0x56c   : > { %v1036_v9 = vsub.f32 %v1030_v2, %v1035_v8 }
 0x56d   : > { %v2052_v10 = vpop.eup %2051 }
 0x56e   : > { %v1037_v11 = vmul.f32 1.442695, %v1036_v9  ;;  %v1213_v12 = vsel %vm859_vm3, %v2052_v10, 0.0 }
 0x56f   : > { %1214 = vadd.xlane.f32.xlu0 %v1213_v12 }
 0x570   : > { %2053 = vpow2.f32 %v1037_v11 }
 0x57d   : > { %v2054_v14 = vpop.eup %2053 }
 0x57e   : > { %v1039_v15 = vsel %vm859_vm3, %v2054_v14, 0.0 }
 0x57f   : > { %1040 = vadd.xlane.f32.xlu0 %v1039_v15 }
 0x595   : > { %1048 = vrot.lane.b32.xlu0 %v2343_v30, %s2146_s0 }
 0x599   : > { %1303 = vrot.lane.b32.xlu0 %v2343_v30, %s2148_s14 }
 0x59d   : > { %1299 = vrot.lane.b32.xlu0 %v2363_v37, %s2148_s14  ;;  %s2480_s14 = scalar_lea.hbm %s2554_s12, %s1847_s30 }
 0x5f8   : > { %v1215_v16 = vpop.xlane.xlu0 %1214 }
 0x5f9   : > { %2055 = vrcp.f32 %v1215_v16 }
 0x606   : > { %v2056_v17 = vpop.eup %2055 }
 0x607   : > { %v1217_v18 = vmul.f32 %v2056_v17, %v2052_v10 }
 0x608   : > { %v1041_v19 = vpop.xlane.xlu0 %1040 }
 0x609   : > { %2057 = vrcp.f32 %v1041_v19  ;;  %1832 = vst.msk [vmem:[%s2396_s17 + $0x10] sm:$0xff] %vm859_vm3, %v1217_v18 }
 0x60c   : > { %v1049_v20 = vpop.permute.xlu0 %1048 }
 0x60d   : > { %1932 = vmatpush3.msra.mxu1 %v1049_v20 }
 0x60e   : > { %1933 = vmatprep.subr.mxu1 %v2141_v13 }
 0x60f   : > { %1934 = vmatpush3.msra.mxu1 %v1047_v21 }
 0x610   : > { %1945 = vmatprep.subr.mxu1 %v2141_v13  ;;  %v1304_v26 = vpop.permute.xlu0 %1303 }
 0x614   : > { %v1300_v28 = vpop.permute.xlu0 %1299 }
 0x616   : > { %v2058_v23 = vpop.eup %2057 }
 0x617   : > { %v1043_v24 = vmul.f32 %v2058_v23, %v2054_v14 }
 0x619   : > { %1827 = vst.msk [vmem:[%s2396_s17 + $0x8] sm:$0xff] %vm859_vm3, %v1043_v24  ;;  %1936 = vmatmul.mubr.msk.f32.vlgmr.msra.gmra.mxu1 %vm859_vm3, %v1043_v24 }
 0x61a   : > { %1946 = vmatpush3.msra.mxu1 %v1223_v22  ;;  %1949 = vmatprep.mubr.msk.f32.mxu1 %vm2142_vm1, %v2141_v13 }
 0x61b   : > { %1947 = vmatprep.subr.mxu1 %v2141_v13 }
 0x61c   : > { %1948 = vmatpush3.msra.mxu1 %v1221_v25 }
 0x61d   : > { %1952 = vmatprep.subr.mxu1 %v2141_v13  ;;  %1950 = vmatmul.mubr.msk.f32.vlgmr.msra.gmra.mxu1 %vm859_vm3, %v1217_v18 }
 0x61e   : > { %1953 = vmatpush3.xpose.msk.msra.mxu1 %vm779_vm2, %v1304_v26  ;;  %1956 = vmatprep.mubr.msk.f32.mxu1 %vm2142_vm1, %v2141_v13 }
 0x61f   : > { %1954 = vmatprep.subr.mxu1 %v2141_v13 }
 0x622   : > { %1955 = vmatpush3.xpose.msk.msra.mxu1 %vm779_vm2, %v1302_v27 }
 0x625   : > { %1957 = vmatmul.mubr.msk.f32.vlgmr.msra.gmra.mxu1 %vm779_vm2, %v1300_v28 }
 0x6d9   : > { %v1121_v29 = vpop.f32.mrf.mxu1 }
 0x6db   : > { %v1937_v31 = vpop.f32.mrf.mxu1 }
 0x6dd   : > { %v1295_v33 = vpop.f32.mrf.mxu1 }
 0x6df   : > { %v1951_v34 = vpop.f32.mrf.mxu1 }
 0x6e5   : > { %v1377_v35 = vpop.f32.mrf.mxu1 }
 0x6e6   : > { %v1378_v36 = vadd.f32 %v1377_v35, %v2377_v40 }
 0x6e7   : > { %v1958_v37 = vpop.f32.mrf.mxu1 }
 0x6e8   : > { %v1381_v38 = vsel %vm859_vm3, %v1378_v36, -inf }
 0x6e9   : > { %1382 = vmax.xlane.f32.xlu1 %v1381_v38 }
 0x6fa   : > { %1394 = vrot.lane.b32.xlu1 %v2349_v32, %s2149_s19 }
 0x6fe   : > { %1474 = vrot.lane.b32.xlu1 %v1121_v29, %s2557_s20 }
 0x772   : > { %v1383_v39 = vpop.xlane.xlu1 %1382 }
 0x773   : > { %v1384_v41 = vsub.f32 %v1378_v36, %v1383_v39 }
 0x775   : > { %v1385_v42 = vmul.f32 1.442695, %v1384_v41 }
 0x776   : > { %v1395_v32 = vpop.permute.xlu1 %1394 }
 0x777   : > { %2059 = vpow2.f32 %v1385_v42 }
 0x77a   : > { %v1475_v53 = vpop.permute.xlu1 %1474 }
 0x77b   : > { %v1485_v55 = vsel %vm779_vm2, %v2412_v62, %v1475_v53 }
 0x784   : > { %v2060_v43 = vpop.eup %2059 }
 0x785   : > { %v1387_v44 = vsel %vm859_vm3, %v2060_v43, 0.0 }
 0x786   : > { %1388 = vadd.xlane.f32.xlu0 %v1387_v44 }
 0x79c   : > { %1396 = vrot.lane.b32.xlu0 %v2343_v30, %s2149_s19  ;;  %v1493_v30 = vld [vmem:[%s2551_s9 + $0x18] sm:$0xff]  ;;  %s2486_s19 = scalar_lea.sflag [#allocation5], %s518_s25 }
 0x7a0   : > { %1478 = vrot.lane.b32.xlu0 %v1295_v33, %s2151_s27  ;;  %s2063_s27 = scalar_lea.vmem %s2482_s29, 512 }
 0x7a1   : > { %p2064_p12 = scmp.ne.s32.totalorder %s2482_s29, %s2063_s27 }
 0x7a3   : > { %p2065_p13 = pnand %p2064_p12, %p2260_p4 }
 0x7a5   : > { %p2066_p0 = pneg %p2065_p13 }
 0x80f   : > { %v1389_v40 = vpop.xlane.xlu0 %1388 }
 0x810   : > { %2061 = vrcp.f32 %v1389_v40 }
 0x813   : > { %v1397_v45 = vpop.permute.xlu0 %1396 }
 0x814   : > { %1960 = vmatpush3.msra.mxu0 %v1397_v45 }
 0x815   : > { %1961 = vmatprep.subr.mxu0 %v2141_v13 }
 0x816   : > { %1962 = vmatpush3.msra.mxu0 %v1395_v32 }
 0x817   : > { %1966 = vmatprep.subr.mxu0 %v2141_v13  ;;  %v1479_v54 = vpop.permute.xlu0 %1478 }
 0x81d   : > { %v2062_v46 = vpop.eup %2061 }
 0x81e   : > { %v1391_v47 = vmul.f32 %v2062_v46, %v2060_v43 }
 0x820   : > { %1837 = vst.msk [vmem:[%s2396_s17 + $0x18] sm:$0xff] %vm859_vm3, %v1391_v47  ;;  %1964 = vmatmul.mubr.msk.f32.vlgmr.msra.gmra.mxu0 %vm859_vm3, %v1391_v47  ;;  %s2067_s17 = sshll.u32 %s2153_s24, 4  ;;  %s2068_s17 = int_to_ptr.vmem [resolvable:$false] %s2067_s17 }
 0x821   : > { %1974 = vmatprep.mubr.msk.f32.mxu0 %vm2142_vm1, %v2141_v13  ;;  %1967 = vmatpush3.msra.mxu0 %v1493_v30  ;;  %p2070_p1 = scmp.lt.s32.totalorder %s2482_s29, %s2068_s17 }
 0x822   : > { %1968 = vmatprep.subr.mxu0 %v2141_v13 }
 0x823   : > { %1969 = vmatpush3.msra.mxu0 %v1492_v48 }
 0x824   : > { %1970 = vmatprep.subr.mxu0 %v2141_v13 }
 0x825   : > { %1971 = vmatpush3.msra.mxu0 %v1491_v49 }
 0x826   : > { %1972 = vmatprep.subr.mxu0 %v2141_v13  ;;  %v1486_v13 = vsel %vm859_vm3, %v1485_v55, %v1479_v54 }
 0x827   : > { %1973 = vmatpush3.msra.mxu0 %v1490_v50 }
 0x8e0   : > { %v1469_v51 = vpop.f32.mrf.mxu0 }
 0x8e1   : > { %1482 = vrot.lane.b32.xlu1 %v1469_v51, %s2152_s28  ;;  %s2069_s28 = scalar_lea.vmem %s2068_s17, 1024 }
 0x8e2   : > { %v1965_v52 = vpop.f32.mrf.mxu0  ;;  %p2071_p2 = scmp.lt.s32.totalorder %s2069_s28, %s2063_s27 }
 0x8e4   : > { %p2072_p3 = por %p2071_p2, %p2070_p1 }
 0x8e6   : > { %p2073_p5 = pnand %p2072_p3, %p2066_p0 }
 0x953   : > { %v1483_v56 = vpop.permute.xlu1 %1482 }
 0x954   : > { %v1488_v57 = vsel %vm1487_vm4, %v1486_v13, %v1483_v56 }
 0x955   : > { %1975 = vmatmul.mubr.msk.f32.vlgmr.msra.gmra.mxu0 %vm567_vm0, %v1488_v57 }
 0x956   : > { %2076 = shalt.err (!%p2073_p5)
}
 0x957   : > { %s2077_s25 = scalar_lea.hbm %s2480_s14, 512  ;;  %s2081_s16 = scalar_lea.hbm %s2554_s12, 1024 }
 0x958   : > { %p2078_p6 = scmp.ne.s32.totalorder %s2480_s14, %s2077_s25  ;;  %p2082_p10 = scmp.lt.s32.totalorder %s2480_s14, %s2554_s12 }
 0x959   : > { %p2083_p11 = scmp.lt.s32.totalorder %s2081_s16, %s2077_s25 }
 0x95a   : > { %p2079_p7 = pnand %p2078_p6, %p2260_p4 }
 0x95b   : > { %p2084_p12 = por %p2083_p11, %p2082_p10 }
 0x95c   : > { %p2080_p9 = pneg %p2079_p7 }
 0x95e   : > { %p2085_p13 = pnand %p2084_p12, %p2080_p9 }
 0x960   : > { %2088 = shalt.err (!%p2085_p13)
}
 0x961   : > { %s2154_s27 = smov 128   ;;  %s2565_s17 = smov 8   ;;  %v1489_v58 = vld [vmem:[#allocation3] sm:$0xff]  ;;  %v1840_v62 = vld [vmem:[%s2552_s10] ss:$0 sm:$0xff] }
 0x962   : > { %1977 = dma.vmem_to_hbm [thread:$0]  (%p2260_p4), %s2482_s29, 512, %s2480_s14, %s2486_s19, %s2154_s27, %s2154_s27, %s2565_s17  }
 0x963   : > { %s558_s30 = scalar_lea.vmem %s2553_s11, %s2277_s18 }
 0xa15   : > { %v1563_v59 = vpop.f32.mrf.mxu0 }
 0xa16   : > { %v1567_v60 = vadd.f32 %v1563_v59, %v1489_v58 }
 0xa17   : > { %v1976_v61 = vpop.f32.mrf.mxu0 }
 0xa18   : > { %1568 = vst.msk [vmem:[#allocation3] sm:$0xff] %vm567_vm0, %v1567_v60 }
 0xa1f   : > { %v1572_v63 = vld [vmem:[#allocation3] sm:$0xff] }
 0xa20   : > { %v1580_v1 = vadd.f32 %v1840_v62, %v1572_v63 }
 0xa22   : > { %v1582_v2 = vadd.f32 %v1580_v1, %v2283_v0 }
 0xa24   : > { %1583 = vst.msk [vmem:[%s558_s30] sm:$0xff] %vm567_vm0, %v1582_v2 }
 0xa25 PF: > { %p1983_p4 = scmp.ge.s32.totalorder %s2139_s26, 2  ;;  %s1629_s29 = sand.u32 1, %s2119_s21  }
 0xa26   : > { %s1630_s14 = scalar_lea.sflag [#allocation5], %s1629_s29 }
 0xa27   : > { %p1980_p0 = pnand %p1983_p4, %p2267_p8 }
 0xa29   : > { %p1981_p1 = pneg %p1980_p0 }
 0xa2b   : > { %2114 = dma.done.wait (%p1981_p1), %s1630_s14, 512  }
 0xa2c   : > { %2116 = vsyncadd (%p1981_p1), %s1630_s14, 4294966784  ;;  %s26_s26 = sadd.s32 1, %s2139_s26   ;;  %s2566_s18 = sld [smem:[#allocation9_spill]] }
 0xa2d   : > { %p23_p2 = scmp.ge.s32.totalorder %s26_s26, 4   ;;  %s2567_s24 = sld [smem:[#allocation7_spill]] }
 0xa2e   : > { %s2568_s25 = sld [smem:[#allocation8_spill]]  ;;  %s2569_s21 = smov %s2123_s22 }
 0xa2f   : > { %s2570_s22 = smov %s2127_s23  ;;  %25 = sbr.rel (!%p23_p2) target bundleno = 6 (0x6), region = 143 }
 0xa32   : > { %s2571_s23 = smov %s2566_s18 }
 0xa34   :  { %1635 = vsyncpa [#allocation5], 1 }
 0xa35   :  { %1637 = vsyncpa [#allocation5 + $0x1], 1 }

</bundles_post_ra>
